<compile_context>
chip_gen: v7x
topology: tpu7x:2x2x1
jax: 0.10.0
libtpu: 0.0.40
codegen_flags: <defaults>
</compile_context>

<pallas_src>
import jax
import jax.numpy as jnp
from jax.experimental import pallas as pl
from jax.experimental.pallas import tpu as pltpu

LATENT = 100
N_CLASSES = 10
EMB = 10
IN_DIM = LATENT + EMB      # 110
IN_PAD = 128               # padded contraction dim of layer 1
H1 = 256
H2 = 512
OUT_DIM = 784              # 28 * 28
OUT_PAD = 896              # 7 * 128, lane-dense output


def _round_up(x, m):
    return (x + m - 1) // m * m


def _mlp_kernel(x_ref, w1_ref, b1_ref, w2_ref, b2_ref, w3_ref, b3_ref, o_ref):
    # x: (TILE_B, 128) bf16 ; weights bf16 ; biases f32 ; output f32.
    x = x_ref[...]

    # Layer 1: (TB,128) @ (128,256) -> f32 acc, bias + ReLU in f32.
    h1 = jnp.dot(x, w1_ref[...], preferred_element_type=jnp.float32) + b1_ref[...]
    h1 = jnp.maximum(h1, 0.0).astype(jnp.bfloat16)

    # Layer 2: (TB,256) @ (256,512) -> ReLU.
    h2 = jnp.dot(h1, w2_ref[...], preferred_element_type=jnp.float32) + b2_ref[...]
    h2 = jnp.maximum(h2, 0.0).astype(jnp.bfloat16)

    # Layer 3: (TB,512) @ (512,896) -> Tanh (f32, EUP).
    h3 = jnp.dot(h2, w3_ref[...], preferred_element_type=jnp.float32) + b3_ref[...]
    o_ref[...] = jnp.tanh(h3)


def generator_mlp(x_pad, params, tile_b):
    """x_pad: (B_pad, 128) bf16, B_pad % tile_b == 0.  Returns (B_pad, 896) f32."""
    w1, b1, w2, b2, w3, b3 = params
    b_pad = x_pad.shape[0]
    grid = (b_pad // tile_b,)

    # Cost hint for XLA scheduling around the custom call.
    flops = 2 * b_pad * (IN_PAD * H1 + H1 * H2 + H2 * OUT_PAD)
    bytes_accessed = (
        (w1.size + w2.size + w3.size) * 2          # bf16 weights
        + (b1.size + b2.size + b3.size) * 4        # f32 biases
        + b_pad * IN_PAD * 2                       # bf16 input
        + b_pad * OUT_PAD * 4                      # f32 output
    )
    cost = pl.CostEstimate(
        flops=flops, transcendentals=b_pad * OUT_PAD, bytes_accessed=bytes_accessed
    )

    return pl.pallas_call(
        _mlp_kernel,
        out_shape=jax.ShapeDtypeStruct((b_pad, OUT_PAD), jnp.float32),
        grid_spec=pltpu.PrefetchScalarGridSpec(
            num_scalar_prefetch=0,
            grid=grid,
            in_specs=[
                # Streamed per grid step.
                pl.BlockSpec((tile_b, IN_PAD), lambda i: (i, 0)),
                # Weights/biases: constant index_map -> resident in VMEM.
                pl.BlockSpec((IN_PAD, H1), lambda i: (0, 0)),
                pl.BlockSpec((1, H1), lambda i: (0, 0)),
                pl.BlockSpec((H1, H2), lambda i: (0, 0)),
                pl.BlockSpec((1, H2), lambda i: (0, 0)),
                pl.BlockSpec((H2, OUT_PAD), lambda i: (0, 0)),
                pl.BlockSpec((1, OUT_PAD), lambda i: (0, 0)),
            ],
            out_specs=pl.BlockSpec((tile_b, OUT_PAD), lambda i: (i, 0)),
        ),
        compiler_params=pltpu.CompilerParams(
            dimension_semantics=("parallel",),     # megacore split on v7x
            vmem_limit_bytes=32 * 1024 * 1024,     # ~8 MB needed; headroom on all chips
        ),
        cost_estimate=cost,
    )(x_pad, w1, b1, w2, b2, w3, b3)


def init_params(key):
    """PyTorch-default init; weights stored (in,out), zero-padded, cast to bf16."""
    ks = jax.random.split(key, 7)

    def lin(kw, kb, fan_in, fan_out):
        bound = 1.0 / jnp.sqrt(fan_in)
        w = jax.random.uniform(kw, (fan_in, fan_out), jnp.float32, -bound, bound)
        b = jax.random.uniform(kb, (1, fan_out), jnp.float32, -bound, bound)
        return w, b

    emb = jax.random.normal(ks[0], (N_CLASSES, EMB), jnp.float32)  # nn.Embedding: N(0,1)
    w1, b1 = lin(ks[1], ks[2], IN_DIM, H1)
    w2, b2 = lin(ks[3], ks[4], H1, H2)
    w3, b3 = lin(ks[5], ks[6], H2, OUT_DIM)

    # Pad K of layer1 (110->128, zero rows) and N of layer3 (784->896, zero cols).
    w1p = jnp.zeros((IN_PAD, H1), jnp.float32).at[:IN_DIM].set(w1)
    w3p = jnp.zeros((H2, OUT_PAD), jnp.float32).at[:, :OUT_DIM].set(w3)
    b3p = jnp.zeros((1, OUT_PAD), jnp.float32).at[:, :OUT_DIM].set(b3)

    params = (
        w1p.astype(jnp.bfloat16), b1,
        w2.astype(jnp.bfloat16), b2,
        w3p.astype(jnp.bfloat16), b3p,
    )
    return emb, params


@jax.jit
def generator_forward(z, labels, emb, params):
    # Embedding lookup + concat: cheap glue in plain JAX.
    lab_vec = jnp.take(emb, labels, axis=0)                     # (B, 10)
    x = jnp.concatenate([z, lab_vec], axis=1)                   # (B, 110)

    B = x.shape[0]
    tile_b = min(256, _round_up(B, 8))
    b_pad = _round_up(B, tile_b)

    # Zero-pad batch to a tile multiple and features 110 -> 128; cast to bf16.
    x_pad = jnp.pad(x, ((0, b_pad - B), (0, IN_PAD - IN_DIM))).astype(jnp.bfloat16)

    out = generator_mlp(x_pad, params, tile_b)                  # (B_pad, 896) f32
    out = out[:B, :OUT_DIM]                                     # drop padding (lane-dense until here)
    return out.reshape(-1, 1, 28, 28)                           # matches .view(-1,1,28,28)


def _reference_forward(z, labels, emb, params):
    """Pure-JAX reference using the same (padded, bf16) params."""
    w1, b1, w2, b2, w3, b3 = params
    lab_vec = jnp.take(emb, labels, axis=0)
    x = jnp.concatenate([z, lab_vec], axis=1)
    x = jnp.pad(x, ((0, 0), (0, IN_PAD - IN_DIM))).astype(jnp.bfloat16)
    h1 = jnp.maximum(jnp.dot(x, w1, preferred_element_type=jnp.float32) + b1, 0.0)
    h2 = jnp.maximum(
        jnp.dot(h1.astype(jnp.bfloat16), w2, preferred_element_type=jnp.float32) + b2, 0.0
    )
    h3 = jnp.dot(h2.astype(jnp.bfloat16), w3, preferred_element_type=jnp.float32) + b3
    return jnp.tanh(h3)[:, :OUT_DIM].reshape(-1, 1, 28, 28)


if __name__ == "__main__":
    key = jax.random.PRNGKey(0)
    k_p, k_z, k_l = jax.random.split(key, 3)

    emb, params = init_params(k_p)

    B = 8
    z = jax.random.normal(k_z, (B, LATENT), jnp.float32)
    labels = jax.random.randint(k_l, (B,), 0, N_CLASSES)

    img = generator_forward(z, labels, emb, params)
    jax.block_until_ready(img)

    assert img.shape == (B, 1, 28, 28), img.shape
    assert img.dtype == jnp.float32
    # Tanh output must be in [-1, 1].
    assert bool(jnp.all(jnp.abs(img) <= 1.0))

    # Numerical check against a pure-JAX reference with identical bf16 params.
    ref = _reference_forward(z, labels, emb, params)
    assert bool(jnp.all(jnp.abs(img - ref) <= 2e-2)), float(jnp.max(jnp.abs(img - ref)))

    print("KERNEL_OK")
</pallas_src>

<mosaic_0001>
module attributes {stable_mosaic.version = 11 : i64} {
  func.func @_mlp_kernel(%arg0: i32, %arg1: memref<8x128xbf16, #tpu.memory_space<vmem>>, %arg2: memref<128x256xbf16, #tpu.memory_space<vmem>>, %arg3: memref<1x256xf32, #tpu.memory_space<vmem>>, %arg4: memref<256x512xbf16, #tpu.memory_space<vmem>>, %arg5: memref<1x512xf32, #tpu.memory_space<vmem>>, %arg6: memref<512x896xbf16, #tpu.memory_space<vmem>>, %arg7: memref<1x896xf32, #tpu.memory_space<vmem>>, %arg8: memref<8x896xf32, #tpu.memory_space<vmem>>) attributes {dimension_semantics = [#tpu.dimension_semantics<parallel>], iteration_bounds = array<i64: 1>, scalar_prefetch = 0 : i64, scratch_operands = 0 : i64, tpu.core_type = #tpu.core_type<tc>, window_params = [{transform_indices = @transform_0, window_bounds = array<i64: 8, 128>}, {pipeline_mode = #tpu.pipeline_mode<synchronous>, transform_indices = @transform_1, window_bounds = array<i64: 128, 256>}, {pipeline_mode = #tpu.pipeline_mode<synchronous>, transform_indices = @transform_2, window_bounds = array<i64: 1, 256>}, {pipeline_mode = #tpu.pipeline_mode<synchronous>, transform_indices = @transform_3, window_bounds = array<i64: 256, 512>}, {pipeline_mode = #tpu.pipeline_mode<synchronous>, transform_indices = @transform_4, window_bounds = array<i64: 1, 512>}, {pipeline_mode = #tpu.pipeline_mode<synchronous>, transform_indices = @transform_5, window_bounds = array<i64: 512, 896>}, {pipeline_mode = #tpu.pipeline_mode<synchronous>, transform_indices = @transform_6, window_bounds = array<i64: 1, 896>}, {transform_indices = @transform_7, window_bounds = array<i64: 8, 896>}]} {
    %c0 = arith.constant 0 : index
    %c0_0 = arith.constant 0 : index
    %0 = vector.load %arg1[%c0, %c0_0] : memref<8x128xbf16, #tpu.memory_space<vmem>>, vector<8x128xbf16>
    %c0_1 = arith.constant 0 : index
    %c0_2 = arith.constant 0 : index
    %1 = vector.load %arg2[%c0_1, %c0_2] : memref<128x256xbf16, #tpu.memory_space<vmem>>, vector<128x256xbf16>
    %cst = arith.constant dense<0.000000e+00> : vector<8x256xf32>
    %2 = tpu.matmul %0, %1, %cst {dimension_numbers = #tpu.dot_dimension_numbers<[1], [0], [0], [1], [0, 0, 1, 1], [], []>} : vector<8x128xbf16>, vector<128x256xbf16>, vector<8x256xf32> -> vector<8x256xf32>
    %c0_3 = arith.constant 0 : index
    %c0_4 = arith.constant 0 : index
    %3 = vector.load %arg3[%c0_3, %c0_4] : memref<1x256xf32, #tpu.memory_space<vmem>>, vector<1x256xf32>
    %4 = vector.broadcast %3 : vector<1x256xf32> to vector<8x256xf32>
    %5 = arith.addf %2, %4 : vector<8x256xf32>
    %cst_5 = arith.constant 0.000000e+00 : f32
    %6 = vector.broadcast %cst_5 : f32 to vector<8x256xf32>
    %7 = arith.maximumf %5, %6 : vector<8x256xf32>
    %8 = arith.truncf %7 : vector<8x256xf32> to vector<8x256xbf16>
    %c0_6 = arith.constant 0 : index
    %c0_7 = arith.constant 0 : index
    %9 = vector.load %arg4[%c0_6, %c0_7] : memref<256x512xbf16, #tpu.memory_space<vmem>>, vector<256x512xbf16>
    %cst_8 = arith.constant dense<0.000000e+00> : vector<8x512xf32>
    %10 = tpu.matmul %8, %9, %cst_8 {dimension_numbers = #tpu.dot_dimension_numbers<[1], [0], [0], [1], [0, 0, 1, 1], [], []>} : vector<8x256xbf16>, vector<256x512xbf16>, vector<8x512xf32> -> vector<8x512xf32>
    %c0_9 = arith.constant 0 : index
    %c0_10 = arith.constant 0 : index
    %11 = vector.load %arg5[%c0_9, %c0_10] : memref<1x512xf32, #tpu.memory_space<vmem>>, vector<1x512xf32>
    %12 = vector.broadcast %11 : vector<1x512xf32> to vector<8x512xf32>
    %13 = arith.addf %10, %12 : vector<8x512xf32>
    %cst_11 = arith.constant 0.000000e+00 : f32
    %14 = vector.broadcast %cst_11 : f32 to vector<8x512xf32>
    %15 = arith.maximumf %13, %14 : vector<8x512xf32>
    %16 = arith.truncf %15 : vector<8x512xf32> to vector<8x512xbf16>
    %c0_12 = arith.constant 0 : index
    %c0_13 = arith.constant 0 : index
    %17 = vector.load %arg6[%c0_12, %c0_13] : memref<512x896xbf16, #tpu.memory_space<vmem>>, vector<512x896xbf16>
    %cst_14 = arith.constant dense<0.000000e+00> : vector<8x896xf32>
    %18 = tpu.matmul %16, %17, %cst_14 {dimension_numbers = #tpu.dot_dimension_numbers<[1], [0], [0], [1], [0, 0, 1, 1], [], []>} : vector<8x512xbf16>, vector<512x896xbf16>, vector<8x896xf32> -> vector<8x896xf32>
    %c0_15 = arith.constant 0 : index
    %c0_16 = arith.constant 0 : index
    %19 = vector.load %arg7[%c0_15, %c0_16] : memref<1x896xf32, #tpu.memory_space<vmem>>, vector<1x896xf32>
    %20 = vector.broadcast %19 : vector<1x896xf32> to vector<8x896xf32>
    %21 = arith.addf %18, %20 : vector<8x896xf32>
    %22 = math.tanh %21 : vector<8x896xf32>
    %c0_17 = arith.constant 0 : index
    %c0_18 = arith.constant 0 : index
    %23 = vector.load %arg8[%c0_17, %c0_18] : memref<8x896xf32, #tpu.memory_space<vmem>>, vector<8x896xf32>
    tpu.vector_store %arg8[%c0_17, %c0_18], %22 {strides = array<i32>} : memref<8x896xf32, #tpu.memory_space<vmem>>, vector<8x896xf32>,
    return
  }
  func.func @transform_0(%arg0: i32) -> (i32, i32) {
    %c0_i32 = arith.constant 0 : i32
    %c0_i32_0 = arith.constant 0 : i32
    return %arg0, %c0_i32 : i32, i32
  }
  func.func @transform_1(%arg0: i32) -> (i32, i32) {
    %c0_i32 = arith.constant 0 : i32
    %c0_i32_0 = arith.constant 0 : i32
    %c0_i32_1 = arith.constant 0 : i32
    return %c0_i32, %c0_i32_0 : i32, i32
  }
  func.func @transform_2(%arg0: i32) -> (i32, i32) {
    %c0_i32 = arith.constant 0 : i32
    %c0_i32_0 = arith.constant 0 : i32
    %c0_i32_1 = arith.constant 0 : i32
    return %c0_i32, %c0_i32_0 : i32, i32
  }
  func.func @transform_3(%arg0: i32) -> (i32, i32) {
    %c0_i32 = arith.constant 0 : i32
    %c0_i32_0 = arith.constant 0 : i32
    %c0_i32_1 = arith.constant 0 : i32
    return %c0_i32, %c0_i32_0 : i32, i32
  }
  func.func @transform_4(%arg0: i32) -> (i32, i32) {
    %c0_i32 = arith.constant 0 : i32
    %c0_i32_0 = arith.constant 0 : i32
    %c0_i32_1 = arith.constant 0 : i32
    return %c0_i32, %c0_i32_0 : i32, i32
  }
  func.func @transform_5(%arg0: i32) -> (i32, i32) {
    %c0_i32 = arith.constant 0 : i32
    %c0_i32_0 = arith.constant 0 : i32
    %c0_i32_1 = arith.constant 0 : i32
    return %c0_i32, %c0_i32_0 : i32, i32
  }
  func.func @transform_6(%arg0: i32) -> (i32, i32) {
    %c0_i32 = arith.constant 0 : i32
    %c0_i32_0 = arith.constant 0 : i32
    %c0_i32_1 = arith.constant 0 : i32
    return %c0_i32, %c0_i32_0 : i32, i32
  }
  func.func @transform_7(%arg0: i32) -> (i32, i32) {
    %c0_i32 = arith.constant 0 : i32
    %c0_i32_0 = arith.constant 0 : i32
    return %arg0, %c0_i32 : i32, i32
  }
}

</mosaic_0001>

<bundles_post_ra>
// kernel: generator_forward.1
= control target key start
LH: loop header
LB: loop body
LE: loop exit
PB: predicated region body
PF: predicated region fallthrough
CT: control target
= control target key end

     0   :  { %12 = vsyncpa [#allocation3], 0  ;;  %s3588_s0 = inlined_call_operand.vmem [shape: bf16[8,128], index: 0, kind: input, shape index: {}]   ;;  %s3589_s1 = inlined_call_operand.hbm [shape: bf16[128,256], index: 1, kind: input, shape index: {}]   ;;  %s3590_s2 = inlined_call_operand.vmem [shape: f32[1,256], index: 2, kind: input, shape index: {}]   ;;  %s3591_s3 = inlined_call_operand.hbm [shape: bf16[256,512], index: 3, kind: input, shape index: {}]   ;;  %s3592_s4 = inlined_call_operand.vmem [shape: f32[1,512], index: 4, kind: input, shape index: {}]   ;;  %s3593_s5 = inlined_call_operand.hbm [shape: bf16[512,896], index: 5, kind: input, shape index: {}]   ;;  %s3594_s6 = inlined_call_operand.vmem [shape: f32[1,896], index: 6, kind: input, shape index: {}]   ;;  %s3595_s7 = inlined_call_operand.vmem [shape: f32[8,896], index: 7, kind: output, shape index: {}]  }
   0x1   :  { %13 = vsyncpa [#allocation5], 0  ;;  %s3409_s24 = smov [#allocation4]   ;;  %s3339_s28 = scalar_lea.hbm %s3591_s3, 8192 }
   0x2   :  { %s35_s25 = sshll.u32 %s3409_s24, 4  ;;  %p3340_p0 = scmp.ne.s32.totalorder %s3591_s3, %s3339_s28  ;;  %s36_s25 = int_to_ptr.vmem [resolvable:$true] %s35_s25 }
   0x3   :  { %p3343_p1 = scmp.lt.u32.totalorder %s3339_s28, %s3591_s3 }
   0x5   :  { %p3345_p2 = pnand %p3343_p1, %p3340_p0 }
   0x7   :  { %3348 = shalt.err (!%p3345_p2)
}
   0x8   :  { %s3349_s10 = scalar_lea.vmem %s36_s25, 8192  ;;  %p3354_p4 = scmp.lt.s32.totalorder %s36_s25, %s36_s25 }
   0x9   :  { %p3350_p3 = scmp.ne.s32.totalorder %s36_s25, %s3349_s10  ;;  %p3355_p5 = scmp.lt.s32.totalorder %s3349_s10, %s3349_s10 }
   0xb   :  { %p3356_p6 = por %p3355_p5, %p3354_p4 }
   0xd   :  { %p3357_p7 = pnand %p3356_p6, %p3350_p3 }
   0xf   :  { %3360 = shalt.err (!%p3357_p7)
}
  0x10   :  { %s3410_s11 = smov 256   ;;  %s3411_s12 = smov 16  }
  0x11   :  { %41 = dma.hbm_to_vmem [thread:$0]  %s3591_s3, 8192, %s36_s25, [#allocation5], %s3410_s11, %s3410_s11, %s3411_s12  }
  0x12   :  { %s3412_s15 = smov [#allocation2]   ;;  %s3361_s19 = scalar_lea.hbm %s3589_s1, 2048 }
  0x13   :  { %s21_s16 = sshll.u32 %s3412_s15, 4  ;;  %p3362_p8 = scmp.ne.s32.totalorder %s3589_s1, %s3361_s19  ;;  %s22_s16 = int_to_ptr.vmem [resolvable:$true] %s21_s16 }
  0x14   :  { %p3365_p9 = scmp.lt.u32.totalorder %s3361_s19, %s3589_s1 }
  0x16   :  { %p3367_p10 = pnand %p3365_p9, %p3362_p8 }
  0x18   :  { %3370 = shalt.err (!%p3367_p10)
}
  0x19   :  { %s3371_s24 = scalar_lea.vmem %s22_s16, 2048  ;;  %p3376_p12 = scmp.lt.s32.totalorder %s22_s16, %s22_s16 }
  0x1a   :  { %p3372_p11 = scmp.ne.s32.totalorder %s22_s16, %s3371_s24  ;;  %p3377_p13 = scmp.lt.s32.totalorder %s3371_s24, %s3371_s24 }
  0x1c   :  { %p3378_p0 = por %p3377_p13, %p3376_p12 }
  0x1e   :  { %p3379_p1 = pnand %p3378_p0, %p3372_p11 }
  0x20   :  { %3382 = shalt.err (!%p3379_p1)
}
  0x21   :  { %s3413_s3 = smov 128   ;;  %s3414_s25 = smov 8  }
  0x22   :  { %27 = dma.hbm_to_vmem [thread:$0]  %s3589_s1, 2048, %s22_s16, [#allocation3], %s3413_s3, %s3413_s3, %s3414_s25  }
  0x23   :  { %s3415_s28 = smov [#allocation6]   ;;  %s3383_s9 = scalar_lea.hbm %s3593_s5, 28672 }
  0x24   :  { %s49_s29 = sshll.u32 %s3415_s28, 4  ;;  %p3384_p2 = scmp.ne.s32.totalorder %s3593_s5, %s3383_s9  ;;  %s50_s29 = int_to_ptr.vmem [resolvable:$true] %s49_s29 }
  0x25   :  { %p3387_p3 = scmp.lt.u32.totalorder %s3383_s9, %s3593_s5 }
  0x27   :  { %p3389_p4 = pnand %p3387_p3, %p3384_p2 }
  0x29   :  { %3392 = shalt.err (!%p3389_p4)
}
  0x2a   :  { %s3393_s14 = scalar_lea.vmem %s50_s29, 28672  ;;  %p3398_p6 = scmp.lt.s32.totalorder %s50_s29, %s50_s29 }
  0x2b   :  { %p3394_p5 = scmp.ne.s32.totalorder %s50_s29, %s3393_s14  ;;  %p3399_p7 = scmp.lt.s32.totalorder %s3393_s14, %s3393_s14 }
  0x2d   :  { %p3400_p8 = por %p3399_p7, %p3398_p6 }
  0x2f   :  { %p3401_p9 = pnand %p3400_p8, %p3394_p5 }
  0x31   :  { %3404 = shalt.err (!%p3401_p9)
}
  0x32   :  { %s3416_s1 = smov 448   ;;  %s3417_s15 = smov 28  }
  0x33   :  { %55 = dma.hbm_to_vmem [thread:$0]  %s3593_s5, 28672, %s50_s29, [#allocation5], %s3416_s1, %s3416_s1, %s3417_s15  }
  0x34   :  { %3405 = dma.done.wait [#allocation3], 2048  }
  0x35   :  { %3406 = vsyncadd [#allocation3], 4294965248 }
  0x36   :  { %3407 = dma.done.wait [#allocation5], 36864  }
  0x37   :  { %3408 = vsyncadd [#allocation5], 4294930432  ;;  %v3418_v0 = vmov 0   ;;  %v2885_v1 = vld [vmem:[#allocation2 + $0x4] ss:$8 sps:$4 sm:$0xff]  }
  0x38   :  { %209 = vmatprep.mubr.bf16.mxu0 %v3418_v0  ;;  %v2887_v2 = vld [vmem:[#allocation2] ss:$8 sps:$4 sm:$0xff]   ;;  %177 = vmatprep.subr.bf16.mxu0 %v2885_v1  ;;  %v2888_v3 = vld [vmem:[#allocation2 + $0x14] ss:$8 sps:$4 sm:$0xff]   ;;  %v2890_v4 = vld [vmem:[#allocation2 + $0x10] ss:$8 sps:$4 sm:$0xff]  }
  0x39   :  { %178 = vmatpush1.bf16.msra.mxu0 %v2887_v2  ;;  %v2891_v5 = vld [vmem:[#allocation2 + $0x24] ss:$8 sps:$4 sm:$0xff]   ;;  %v2893_v6 = vld [vmem:[#allocation2 + $0x20] ss:$8 sps:$4 sm:$0xff]   ;;  %v2894_v7 = vld [vmem:[#allocation2 + $0x34] ss:$8 sps:$4 sm:$0xff]  }
  0x3a   :  { %179 = vmatprep.subr.bf16.mxu0 %v2888_v3  ;;  %v2896_v8 = vld [vmem:[#allocation2 + $0x30] ss:$8 sps:$4 sm:$0xff]   ;;  %v2909_v9 = vld [vmem:[#allocation4 + $0x4] ss:$16 sps:$4 sm:$0xff]   ;;  %v2899_v13 = vld [vmem:[#allocation2 + $0x40] ss:$8 sps:$4 sm:$0xff]  }
  0x3b   :  { %v2897_v10 = vld [vmem:[#allocation2 + $0x44] ss:$8 sps:$4 sm:$0xff]   ;;  %628 = vmatprep.subr.bf16.mxu1 %v2909_v9  ;;  %v2914_v11 = vld [vmem:[#allocation4] ss:$16 sps:$4 sm:$0xff]   ;;  %v2900_v14 = vld [vmem:[#allocation2 + $0x54] ss:$8 sps:$4 sm:$0xff]  }
  0x3c   :  { %v2915_v12 = vld [vmem:[#allocation4 + $0x24] ss:$16 sps:$4 sm:$0xff]   ;;  %629 = vmatpush1.bf16.msra.mxu1 %v2914_v11  ;;  %v2920_v15 = vld [vmem:[#allocation4 + $0x20] ss:$16 sps:$4 sm:$0xff]   ;;  %v2913_v26 = vld [vmem:[#allocation4 + $0xc] ss:$16 sps:$4 sm:$0xff]  }
  0x3d   :  { %180 = vmatpush1.bf16.msra.mxu0 %v2890_v4  ;;  %630 = vmatprep.subr.bf16.mxu1 %v2915_v12  ;;  %v2921_v16 = vld [vmem:[#allocation4 + $0x44] ss:$16 sps:$4 sm:$0xff]   ;;  %v2902_v17 = vld [vmem:[#allocation2 + $0x50] ss:$8 sps:$4 sm:$0xff]   ;;  %v2905_v21 = vld [vmem:[#allocation2 + $0x60] ss:$8 sps:$4 sm:$0xff]  }
  0x3e   :  { %181 = vmatprep.subr.bf16.mxu0 %v2891_v5  ;;  %v2903_v18 = vld [vmem:[#allocation2 + $0x64] ss:$8 sps:$4 sm:$0xff]   ;;  %v2926_v19 = vld [vmem:[#allocation4 + $0x40] ss:$16 sps:$4 sm:$0xff]   ;;  %v2906_v22 = vld [vmem:[#allocation2 + $0x74] ss:$8 sps:$4 sm:$0xff]  }
  0x3f   :  { %v2927_v20 = vld [vmem:[#allocation4 + $0x64] ss:$16 sps:$4 sm:$0xff]   ;;  %v2932_v23 = vld [vmem:[#allocation4 + $0x60] ss:$16 sps:$4 sm:$0xff]   ;;  %v2911_v30 = vld [vmem:[#allocation4 + $0x8] ss:$16 sps:$4 sm:$0xff]  }
  0x40   :  { %631 = vmatpush1.bf16.msra.mxu1 %v2920_v15  ;;  %v2933_v24 = vld [vmem:[#allocation4 + $0x84] ss:$16 sps:$4 sm:$0xff]   ;;  %v2908_v25 = vld [vmem:[#allocation2 + $0x70] ss:$8 sps:$4 sm:$0xff]   ;;  %v68_v29 = vld [vmem:[%s3588_s0] sm:$0xf] }
  0x41   :  { %182 = vmatpush1.bf16.msra.mxu0 %v2893_v6  ;;  %632 = vmatprep.subr.bf16.mxu1 %v2921_v16  ;;  %v2938_v27 = vld [vmem:[#allocation4 + $0x80] ss:$16 sps:$4 sm:$0xff]   ;;  %v2939_v28 = vld [vmem:[#allocation4 + $0xa4] ss:$16 sps:$4 sm:$0xff]   ;;  %v2919_v31 = vld [vmem:[#allocation4 + $0x2c] ss:$16 sps:$4 sm:$0xff]  }
  0x42   :  { %183 = vmatprep.subr.bf16.mxu0 %v2894_v7  ;;  %v2944_v32 = vld [vmem:[#allocation4 + $0xa0] ss:$16 sps:$4 sm:$0xff]   ;;  %v2945_v33 = vld [vmem:[#allocation4 + $0xc4] ss:$16 sps:$4 sm:$0xff]   ;;  %v2917_v34 = vld [vmem:[#allocation4 + $0x28] ss:$16 sps:$4 sm:$0xff]  }
  0x43   :  { %v2925_v35 = vld [vmem:[#allocation4 + $0x4c] ss:$16 sps:$4 sm:$0xff]   ;;  %v2950_v36 = vld [vmem:[#allocation4 + $0xc0] ss:$16 sps:$4 sm:$0xff]   ;;  %v2951_v37 = vld [vmem:[#allocation4 + $0xe4] ss:$16 sps:$4 sm:$0xff]  }
  0x44   :  { %633 = vmatpush1.bf16.msra.mxu1 %v2926_v19  ;;  %v2923_v38 = vld [vmem:[#allocation4 + $0x48] ss:$16 sps:$4 sm:$0xff]   ;;  %v2931_v39 = vld [vmem:[#allocation4 + $0x6c] ss:$16 sps:$4 sm:$0xff]   ;;  %v2956_v40 = vld [vmem:[#allocation4 + $0xe0] ss:$16 sps:$4 sm:$0xff]  }
  0x45   :  { %184 = vmatpush1.bf16.msra.mxu0 %v2896_v8  ;;  %634 = vmatprep.subr.bf16.mxu1 %v2927_v20  ;;  %v2957_v41 = vld [vmem:[#allocation4 + $0x104] ss:$16 sps:$4 sm:$0xff]   ;;  %v2929_v42 = vld [vmem:[#allocation4 + $0x68] ss:$16 sps:$4 sm:$0xff]   ;;  %v2937_v43 = vld [vmem:[#allocation4 + $0x8c] ss:$16 sps:$4 sm:$0xff]   ;;  %v87_v20 = vlaneseq }
  0x46   :  { %185 = vmatprep.subr.bf16.mxu0 %v2897_v10  ;;  %v2962_v44 = vld [vmem:[#allocation4 + $0x100] ss:$16 sps:$4 sm:$0xff]   ;;  %v2963_v45 = vld [vmem:[#allocation4 + $0x124] ss:$16 sps:$4 sm:$0xff]   ;;  %v2935_v46 = vld [vmem:[#allocation4 + $0x88] ss:$16 sps:$4 sm:$0xff]  }
  0x47   :  { %v2968_v47 = vld [vmem:[#allocation4 + $0x120] ss:$16 sps:$4 sm:$0xff]   ;;  %v2943_v48 = vld [vmem:[#allocation4 + $0xac] ss:$16 sps:$4 sm:$0xff]   ;;  %v2969_v49 = vld [vmem:[#allocation4 + $0x144] ss:$16 sps:$4 sm:$0xff]  }
  0x48   :  { %635 = vmatpush1.bf16.msra.mxu1 %v2932_v23  ;;  %v2941_v50 = vld [vmem:[#allocation4 + $0xa8] ss:$16 sps:$4 sm:$0xff]   ;;  %v2974_v51 = vld [vmem:[#allocation4 + $0x140] ss:$16 sps:$4 sm:$0xff]   ;;  %v2949_v52 = vld [vmem:[#allocation4 + $0xcc] ss:$16 sps:$4 sm:$0xff]  }
  0x49   :  { %186 = vmatpush1.bf16.msra.mxu0 %v2899_v13  ;;  %636 = vmatprep.subr.bf16.mxu1 %v2933_v24  ;;  %v2975_v53 = vld [vmem:[#allocation4 + $0x164] ss:$16 sps:$4 sm:$0xff]   ;;  %v2947_v54 = vld [vmem:[#allocation4 + $0xc8] ss:$16 sps:$4 sm:$0xff]   ;;  %v2980_v55 = vld [vmem:[#allocation4 + $0x160] ss:$16 sps:$4 sm:$0xff]  }
  0x4a   :  { %187 = vmatprep.subr.bf16.mxu0 %v2900_v14  ;;  %v2955_v56 = vld [vmem:[#allocation4 + $0xec] ss:$16 sps:$4 sm:$0xff]   ;;  %v2981_v57 = vld [vmem:[#allocation4 + $0x184] ss:$16 sps:$4 sm:$0xff]   ;;  %v2953_v58 = vld [vmem:[#allocation4 + $0xe8] ss:$16 sps:$4 sm:$0xff]  }
  0x4b   :  { %v2986_v59 = vld [vmem:[#allocation4 + $0x180] ss:$16 sps:$4 sm:$0xff]   ;;  %v2961_v60 = vld [vmem:[#allocation4 + $0x10c] ss:$16 sps:$4 sm:$0xff]   ;;  %v2987_v61 = vld [vmem:[#allocation4 + $0x1a4] ss:$16 sps:$4 sm:$0xff]  }
  0x4c   :  { %637 = vmatpush1.bf16.msra.mxu1 %v2938_v27  ;;  %v2959_v62 = vld [vmem:[#allocation4 + $0x108] ss:$16 sps:$4 sm:$0xff]   ;;  %v2992_v63 = vld [vmem:[#allocation4 + $0x1a0] ss:$16 sps:$4 sm:$0xff]   ;;  %v2967_v0 = vld [vmem:[#allocation4 + $0x12c] ss:$16 sps:$4 sm:$0xff]  }
  0x4d   :  { %188 = vmatpush1.bf16.msra.mxu0 %v2902_v17  ;;  %638 = vmatprep.subr.bf16.mxu1 %v2939_v28  ;;  %v2965_v1 = vld [vmem:[#allocation4 + $0x128] ss:$16 sps:$4 sm:$0xff]   ;;  %v2973_v2 = vld [vmem:[#allocation4 + $0x14c] ss:$16 sps:$4 sm:$0xff]   ;;  %v2993_v10 = vld [vmem:[#allocation4 + $0x1c4] ss:$16 sps:$4 sm:$0xff]  }
  0x4e   :  { %189 = vmatprep.subr.bf16.mxu0 %v2903_v18  ;;  %v2971_v3 = vld [vmem:[#allocation4 + $0x148] ss:$16 sps:$4 sm:$0xff]   ;;  %v2979_v4 = vld [vmem:[#allocation4 + $0x16c] ss:$16 sps:$4 sm:$0xff]   ;;  %v2998_v13 = vld [vmem:[#allocation4 + $0x1c0] ss:$16 sps:$4 sm:$0xff]  }
  0x4f   :  { %v2977_v5 = vld [vmem:[#allocation4 + $0x168] ss:$16 sps:$4 sm:$0xff]   ;;  %v2985_v6 = vld [vmem:[#allocation4 + $0x18c] ss:$16 sps:$4 sm:$0xff]   ;;  %v2999_v14 = vld [vmem:[#allocation4 + $0x1e4] ss:$16 sps:$4 sm:$0xff]  }
  0x50   :  { %639 = vmatpush1.bf16.msra.mxu1 %v2944_v32  ;;  %v2983_v7 = vld [vmem:[#allocation4 + $0x188] ss:$16 sps:$4 sm:$0xff]   ;;  %v2991_v8 = vld [vmem:[#allocation4 + $0x1ac] ss:$16 sps:$4 sm:$0xff]   ;;  %v3004_v17 = vld [vmem:[#allocation4 + $0x1e0] ss:$16 sps:$4 sm:$0xff]  }
  0x51   :  { %190 = vmatpush1.bf16.msra.mxu0 %v2905_v21  ;;  %640 = vmatprep.subr.bf16.mxu1 %v2945_v33  ;;  %v2989_v9 = vld [vmem:[#allocation4 + $0x1a8] ss:$16 sps:$4 sm:$0xff]   ;;  %v2997_v11 = vld [vmem:[#allocation4 + $0x1cc] ss:$16 sps:$4 sm:$0xff]   ;;  %v3007_v18 = vld [vmem:[#allocation6 + $0x4] ss:$28 sps:$4 sm:$0xff]  }
  0x52   :  { %191 = vmatprep.subr.bf16.mxu0 %v2906_v22  ;;  %v2995_v12 = vld [vmem:[#allocation4 + $0x1c8] ss:$16 sps:$4 sm:$0xff]   ;;  %v3003_v15 = vld [vmem:[#allocation4 + $0x1ec] ss:$16 sps:$4 sm:$0xff]   ;;  %v3498_v21 = vshrl.u32 %v87_v20, 7 }
  0x53   :  { %v3001_v16 = vld [vmem:[#allocation4 + $0x1e8] ss:$16 sps:$4 sm:$0xff]   ;;  %v85_v23 = vld [vmem:[%s3590_s2] sm:$0x3] }
  0x54   :  { %641 = vmatpush1.bf16.msra.mxu1 %v2950_v36  ;;  %v3010_v19 = vld [vmem:[#allocation6 + $0xc] ss:$28 sps:$4 sm:$0xff]   ;;  %v3501_v22 = vsub.s32 0, %v3498_v21  ;;  %v3507_v24 = vsub.s32 1, %v3498_v21  ;;  %v3005_v36 = vld [vmem:[#allocation6] ss:$28 sps:$4 sm:$0xff]  }
  0x55   :  { %192 = vmatpush1.bf16.msra.mxu0 %v2908_v25  ;;  %642 = vmatprep.subr.bf16.mxu1 %v2951_v37  ;;  %v3008_v37 = vld [vmem:[#allocation6 + $0x8] ss:$28 sps:$4 sm:$0xff]  }
  0x56   :  { %669 = vmatprep.subr.bf16.mxu0 %v2913_v26  ;;  %v90_v25 = vrot.slane %v85_v23, %v3501_v22  ;;  %v94_v26 = vrot.slane %v85_v23, %v3507_v24  ;;  %v3082_v20 = vld [vmem:[#allocation6 + $0x2ac] ss:$28 sps:$4 sm:$0xff]   ;;  %v3077_v23 = vld [vmem:[#allocation6 + $0x2a0] ss:$28 sps:$4 sm:$0xff]  }
  0x58   :  { %210 = vmatmul.mubr.bf16.vlgmr.msra.gmra.mrb[0].mxu0 %v68_v29  ;;  %643 = vmatpush1.bf16.msra.mxu1 %v2956_v40  ;;  %v3016_v40 = vld [vmem:[#allocation6 + $0x44] ss:$28 sps:$4 sm:$0xff]  }
  0x59   :  { %670 = vmatpush1.bf16.msra.mxu0 %v2911_v30  ;;  %644 = vmatprep.subr.bf16.mxu1 %v2957_v41  ;;  %v3011_v41 = vld [vmem:[#allocation6 + $0x38] ss:$28 sps:$4 sm:$0xff]  }
  0x5a   :  { %671 = vmatprep.subr.bf16.mxu0 %v2919_v31 }
  0x5c   :  { %645 = vmatpush1.bf16.msra.mxu1 %v2962_v44  ;;  %v3022_v44 = vld [vmem:[#allocation6 + $0x7c] ss:$28 sps:$4 sm:$0xff]  }
  0x5d   :  { %672 = vmatpush1.bf16.msra.mxu0 %v2917_v34  ;;  %646 = vmatprep.subr.bf16.mxu1 %v2963_v45  ;;  %v3017_v45 = vld [vmem:[#allocation6 + $0x70] ss:$28 sps:$4 sm:$0xff]  }
  0x5e   :  { %673 = vmatprep.subr.bf16.mxu0 %v2925_v35 }
  0x60   :  { %647 = vmatpush1.bf16.msra.mxu1 %v2968_v47  ;;  %v3025_v47 = vld [vmem:[#allocation6 + $0xac] ss:$28 sps:$4 sm:$0xff]  }
  0x61   :  { %674 = vmatpush1.bf16.msra.mxu0 %v2923_v38  ;;  %648 = vmatprep.subr.bf16.mxu1 %v2969_v49  ;;  %v3023_v49 = vld [vmem:[#allocation6 + $0xa8] ss:$28 sps:$4 sm:$0xff]  }
  0x62   :  { %675 = vmatprep.subr.bf16.mxu0 %v2931_v39  ;;  %v3013_v39 = vld [vmem:[#allocation6 + $0x3c] ss:$28 sps:$4 sm:$0xff]  }
  0x64   :  { %649 = vmatpush1.bf16.msra.mxu1 %v2974_v51  ;;  %v3031_v51 = vld [vmem:[#allocation6 + $0xe4] ss:$28 sps:$4 sm:$0xff]  }
  0x65   :  { %676 = vmatpush1.bf16.msra.mxu0 %v2929_v42  ;;  %650 = vmatprep.subr.bf16.mxu1 %v2975_v53  ;;  %v3014_v42 = vld [vmem:[#allocation6 + $0x40] ss:$28 sps:$4 sm:$0xff]  }
  0x66   :  { %677 = vmatprep.subr.bf16.mxu0 %v2937_v43  ;;  %v3019_v43 = vld [vmem:[#allocation6 + $0x74] ss:$28 sps:$4 sm:$0xff]   ;;  %v3029_v53 = vld [vmem:[#allocation6 + $0xe0] ss:$28 sps:$4 sm:$0xff]  }
  0x68   :  { %651 = vmatpush1.bf16.msra.mxu1 %v2980_v55  ;;  %v3037_v55 = vld [vmem:[#allocation6 + $0x11c] ss:$28 sps:$4 sm:$0xff]  }
  0x69   :  { %678 = vmatpush1.bf16.msra.mxu0 %v2935_v46  ;;  %652 = vmatprep.subr.bf16.mxu1 %v2981_v57  ;;  %v3020_v46 = vld [vmem:[#allocation6 + $0x78] ss:$28 sps:$4 sm:$0xff]  }
  0x6a   :  { %679 = vmatprep.subr.bf16.mxu0 %v2943_v48  ;;  %v3028_v48 = vld [vmem:[#allocation6 + $0xb4] ss:$28 sps:$4 sm:$0xff]  }
  0x6b   :  { %v3035_v57 = vld [vmem:[#allocation6 + $0x118] ss:$28 sps:$4 sm:$0xff]  }
  0x6c   :  { %653 = vmatpush1.bf16.msra.mxu1 %v2986_v59  ;;  %v3043_v59 = vld [vmem:[#allocation6 + $0x154] ss:$28 sps:$4 sm:$0xff]  }
  0x6d   :  { %680 = vmatpush1.bf16.msra.mxu0 %v2941_v50  ;;  %654 = vmatprep.subr.bf16.mxu1 %v2987_v61  ;;  %v3026_v50 = vld [vmem:[#allocation6 + $0xb0] ss:$28 sps:$4 sm:$0xff]  }
  0x6e   :  { %681 = vmatprep.subr.bf16.mxu0 %v2949_v52  ;;  %v3034_v52 = vld [vmem:[#allocation6 + $0xec] ss:$28 sps:$4 sm:$0xff]  }
  0x6f   :  { %v3041_v61 = vld [vmem:[#allocation6 + $0x150] ss:$28 sps:$4 sm:$0xff]  }
  0x70   :  { %655 = vmatpush1.bf16.msra.mxu1 %v2992_v63  ;;  %v3049_v63 = vld [vmem:[#allocation6 + $0x18c] ss:$28 sps:$4 sm:$0xff]  }
  0x71   :  { %682 = vmatpush1.bf16.msra.mxu0 %v2947_v54  ;;  %656 = vmatprep.subr.bf16.mxu1 %v2993_v10  ;;  %v3032_v54 = vld [vmem:[#allocation6 + $0xe8] ss:$28 sps:$4 sm:$0xff]   ;;  %v3062_v10 = vld [vmem:[#allocation6 + $0x200] ss:$28 sps:$4 sm:$0xff]  }
  0x72   :  { %683 = vmatprep.subr.bf16.mxu0 %v2955_v56  ;;  %v3040_v56 = vld [vmem:[#allocation6 + $0x124] ss:$28 sps:$4 sm:$0xff]  }
  0x74   :  { %657 = vmatpush1.bf16.msra.mxu1 %v2998_v13  ;;  %v3065_v13 = vld [vmem:[#allocation6 + $0x230] ss:$28 sps:$4 sm:$0xff]  }
  0x75   :  { %684 = vmatpush1.bf16.msra.mxu0 %v2953_v58  ;;  %658 = vmatprep.subr.bf16.mxu1 %v2999_v14  ;;  %v3038_v58 = vld [vmem:[#allocation6 + $0x120] ss:$28 sps:$4 sm:$0xff]   ;;  %v3068_v14 = vld [vmem:[#allocation6 + $0x238] ss:$28 sps:$4 sm:$0xff]  }
  0x76   :  { %685 = vmatprep.subr.bf16.mxu0 %v2961_v60  ;;  %v3046_v60 = vld [vmem:[#allocation6 + $0x15c] ss:$28 sps:$4 sm:$0xff]  }
  0x78   :  { %659 = vmatpush1.bf16.msra.mxu1 %v3004_v17  ;;  %v3071_v17 = vld [vmem:[#allocation6 + $0x268] ss:$28 sps:$4 sm:$0xff]  }
  0x79   :  { %686 = vmatpush1.bf16.msra.mxu0 %v2959_v62  ;;  %2163 = vmatprep.subr.bf16.mxu1 %v3007_v18  ;;  %v3044_v62 = vld [vmem:[#allocation6 + $0x158] ss:$28 sps:$4 sm:$0xff]   ;;  %v3074_v18 = vld [vmem:[#allocation6 + $0x270] ss:$28 sps:$4 sm:$0xff]  }
  0x7a   :  { %687 = vmatprep.subr.bf16.mxu0 %v2967_v0  ;;  %v3052_v0 = vld [vmem:[#allocation6 + $0x194] ss:$28 sps:$4 sm:$0xff]  }
  0x7d   :  { %688 = vmatpush1.bf16.msra.mxu0 %v2965_v1  ;;  %v3047_v1 = vld [vmem:[#allocation6 + $0x188] ss:$28 sps:$4 sm:$0xff]  }
  0x7e   :  { %689 = vmatprep.subr.bf16.mxu0 %v2973_v2  ;;  %v3050_v2 = vld [vmem:[#allocation6 + $0x190] ss:$28 sps:$4 sm:$0xff]  }
  0x81   :  { %690 = vmatpush1.bf16.msra.mxu0 %v2971_v3  ;;  %v3055_v3 = vld [vmem:[#allocation6 + $0x1c4] ss:$28 sps:$4 sm:$0xff]  }
  0x82   :  { %691 = vmatprep.subr.bf16.mxu0 %v2979_v4  ;;  %v3058_v4 = vld [vmem:[#allocation6 + $0x1cc] ss:$28 sps:$4 sm:$0xff]  }
  0x85   :  { %692 = vmatpush1.bf16.msra.mxu0 %v2977_v5  ;;  %v3053_v5 = vld [vmem:[#allocation6 + $0x1c0] ss:$28 sps:$4 sm:$0xff]  }
  0x86   :  { %693 = vmatprep.subr.bf16.mxu0 %v2985_v6  ;;  %v3056_v6 = vld [vmem:[#allocation6 + $0x1c8] ss:$28 sps:$4 sm:$0xff]  }
  0x89   :  { %694 = vmatpush1.bf16.msra.mxu0 %v2983_v7  ;;  %v3061_v7 = vld [vmem:[#allocation6 + $0x1fc] ss:$28 sps:$4 sm:$0xff]  }
  0x8a   :  { %695 = vmatprep.subr.bf16.mxu0 %v2991_v8  ;;  %v3064_v8 = vld [vmem:[#allocation6 + $0x204] ss:$28 sps:$4 sm:$0xff]  }
  0x8d   :  { %696 = vmatpush1.bf16.msra.mxu0 %v2989_v9  ;;  %v3059_v9 = vld [vmem:[#allocation6 + $0x1f8] ss:$28 sps:$4 sm:$0xff]  }
  0x8e   :  { %697 = vmatprep.subr.bf16.mxu0 %v2997_v11  ;;  %v3067_v11 = vld [vmem:[#allocation6 + $0x234] ss:$28 sps:$4 sm:$0xff]  }
  0x91   :  { %698 = vmatpush1.bf16.msra.mxu0 %v2995_v12  ;;  %v3070_v12 = vld [vmem:[#allocation6 + $0x23c] ss:$28 sps:$4 sm:$0xff]  }
  0x92   :  { %699 = vmatprep.subr.bf16.mxu0 %v3003_v15  ;;  %v3073_v15 = vld [vmem:[#allocation6 + $0x26c] ss:$28 sps:$4 sm:$0xff]  }
  0x95   :  { %700 = vmatpush1.bf16.msra.mxu0 %v3001_v16  ;;  %v3076_v16 = vld [vmem:[#allocation6 + $0x274] ss:$28 sps:$4 sm:$0xff]  }
  0x96   :  { %2245 = vmatprep.subr.bf16.mxu0 %v3010_v19  ;;  %v3079_v19 = vld [vmem:[#allocation6 + $0x2a4] ss:$28 sps:$4 sm:$0xff]  }
 0x12b   :  { %v211_v27 = vpop.f32.mrb[0].mxu0 }
 0x12c   :  { %v212_v28 = vadd.f32 %v211_v27, %v90_v25  ;;  %v213_v29 = vpop.f32.mrb[1].mxu0  ;;  %v3080_v25 = vld [vmem:[#allocation6 + $0x2a8] ss:$28 sps:$4 sm:$0xff]  }
 0x12d   :  { %v214_v30 = vadd.f32 %v213_v29, %v94_v26  ;;  %v215_v31 = vpop.f32.mrb[2].mxu0  ;;  %v3085_v26 = vld [vmem:[#allocation6 + $0x2dc] ss:$28 sps:$4 sm:$0xff]   ;;  %v3088_v27 = vld [vmem:[#allocation6 + $0x2e4] ss:$28 sps:$4 sm:$0xff]  }
 0x12e   :  { %v218_v32 = vmax.f32 %v212_v28, 0.0  ;;  %v216_v33 = vpop.f32.mrb[3].mxu0  ;;  %v3083_v28 = vld [vmem:[#allocation6 + $0x2d8] ss:$28 sps:$4 sm:$0xff]   ;;  %v3086_v29 = vld [vmem:[#allocation6 + $0x2e0] ss:$28 sps:$4 sm:$0xff]  }
 0x12f   :  { %v219_v34 = vmax.f32 %v214_v30, 0.0  ;;  %v3091_v30 = vld [vmem:[#allocation6 + $0x314] ss:$28 sps:$4 sm:$0xff]   ;;  %v3094_v31 = vld [vmem:[#allocation6 + $0x31c] ss:$28 sps:$4 sm:$0xff]  }
 0x130   :  { %v220_v38 = vpack.c.bf16 %v218_v32, %v218_v32  ;;  %v3089_v32 = vld [vmem:[#allocation6 + $0x310] ss:$28 sps:$4 sm:$0xff]   ;;  %v3092_v33 = vld [vmem:[#allocation6 + $0x318] ss:$28 sps:$4 sm:$0xff]  }
 0x131   :  { %v221_v35 = vpack.c.bf16 %v219_v34, %v219_v34  ;;  %v3097_v34 = vld [vmem:[#allocation6 + $0x34c] ss:$28 sps:$4 sm:$0xff]  }
 0x133   :  { %660 = vmatprep.mubr.bf16.mxu1 %v221_v35  ;;  %701 = vmatprep.mubr.bf16.mxu0 %v221_v35  ;;  %v3100_v35 = vld [vmem:[#allocation6 + $0x354] ss:$28 sps:$4 sm:$0xff]  }
 0x134   :  { %661 = vmatmul.mubr.bf16.vlgmr.msra.gmra.mrb[0].mxu1 %v220_v38  ;;  %702 = vmatmul.mubr.bf16.vlgmr.msra.gmra.mrb[4].mxu0 %v220_v38  ;;  %v3103_v38 = vld [vmem:[#allocation6 + $0x384] ss:$28 sps:$4 sm:$0xff]  }
 0x135   :  { %2164 = vmatpush1.bf16.msra.mxu1 %v3005_v36  ;;  %2246 = vmatpush1.bf16.msra.mxu0 %v3008_v37  ;;  %v3095_v36 = vld [vmem:[#allocation6 + $0x348] ss:$28 sps:$4 sm:$0xff]   ;;  %v3098_v37 = vld [vmem:[#allocation6 + $0x350] ss:$28 sps:$4 sm:$0xff]  }
 0x136   :  { %2165 = vmatprep.subr.bf16.mxu1 %v3013_v39  ;;  %2247 = vmatprep.subr.bf16.mxu0 %v3016_v40  ;;  %v3106_v39 = vld [vmem:[#allocation6 + $0x38c] ss:$28 sps:$4 sm:$0xff]   ;;  %v3514_v40 = vld [vmem:[%s3592_s4] sm:$0xf] }
 0x139   :  { %2166 = vmatpush1.bf16.msra.mxu1 %v3011_v41  ;;  %2248 = vmatpush1.bf16.msra.mxu0 %v3014_v42  ;;  %v302_v41 = vsub.s32 3, %v3498_v21  ;;  %v291_v42 = vrot.slane %v3514_v40, %v3501_v22 }
 0x13a   :  { %2167 = vmatprep.subr.bf16.mxu1 %v3019_v43  ;;  %2249 = vmatprep.subr.bf16.mxu0 %v3022_v44  ;;  %v295_v43 = vrot.slane %v3514_v40, %v3507_v24 }
 0x13b   :  { %v303_v44 = vrot.slane %v3514_v40, %v302_v41 }
 0x13d   :  { %2168 = vmatpush1.bf16.msra.mxu1 %v3017_v45  ;;  %2250 = vmatpush1.bf16.msra.mxu0 %v3020_v46 }
 0x13e   :  { %2169 = vmatprep.subr.bf16.mxu1 %v3025_v47  ;;  %2251 = vmatprep.subr.bf16.mxu0 %v3028_v48 }
 0x141   :  { %2170 = vmatpush1.bf16.msra.mxu1 %v3023_v49  ;;  %2252 = vmatpush1.bf16.msra.mxu0 %v3026_v50 }
 0x142   :  { %2171 = vmatprep.subr.bf16.mxu1 %v3031_v51  ;;  %2253 = vmatprep.subr.bf16.mxu0 %v3034_v52 }
 0x145   :  { %2172 = vmatpush1.bf16.msra.mxu1 %v3029_v53  ;;  %2254 = vmatpush1.bf16.msra.mxu0 %v3032_v54 }
 0x146   :  { %2173 = vmatprep.subr.bf16.mxu1 %v3037_v55  ;;  %2255 = vmatprep.subr.bf16.mxu0 %v3040_v56 }
 0x149   :  { %2174 = vmatpush1.bf16.msra.mxu1 %v3035_v57  ;;  %2256 = vmatpush1.bf16.msra.mxu0 %v3038_v58 }
 0x14a   :  { %2175 = vmatprep.subr.bf16.mxu1 %v3043_v59  ;;  %2257 = vmatprep.subr.bf16.mxu0 %v3046_v60  ;;  %v3101_v60 = vld [vmem:[#allocation6 + $0x380] ss:$28 sps:$4 sm:$0xff]  }
 0x14d   :  { %2176 = vmatpush1.bf16.msra.mxu1 %v3041_v61  ;;  %2258 = vmatpush1.bf16.msra.mxu0 %v3044_v62  ;;  %v3104_v61 = vld [vmem:[#allocation6 + $0x388] ss:$28 sps:$4 sm:$0xff]  }
 0x14e   :  { %2177 = vmatprep.subr.bf16.mxu1 %v3049_v63  ;;  %2259 = vmatprep.subr.bf16.mxu0 %v3052_v0  ;;  %v3109_v63 = vld [vmem:[#allocation6 + $0x3bc] ss:$28 sps:$4 sm:$0xff]   ;;  %v3112_v0 = vld [vmem:[#allocation6 + $0x3c4] ss:$28 sps:$4 sm:$0xff]  }
 0x151   :  { %2178 = vmatpush1.bf16.msra.mxu1 %v3047_v1  ;;  %2260 = vmatpush1.bf16.msra.mxu0 %v3050_v2  ;;  %v3107_v2 = vld [vmem:[#allocation6 + $0x3b8] ss:$28 sps:$4 sm:$0xff]  }
 0x152   :  { %2179 = vmatprep.subr.bf16.mxu1 %v3055_v3  ;;  %2261 = vmatprep.subr.bf16.mxu0 %v3058_v4  ;;  %v3110_v3 = vld [vmem:[#allocation6 + $0x3c0] ss:$28 sps:$4 sm:$0xff]   ;;  %v3115_v4 = vld [vmem:[#allocation6 + $0x3f4] ss:$28 sps:$4 sm:$0xff]  }
 0x155   :  { %2180 = vmatpush1.bf16.msra.mxu1 %v3053_v5  ;;  %2262 = vmatpush1.bf16.msra.mxu0 %v3056_v6  ;;  %v3118_v5 = vld [vmem:[#allocation6 + $0x3fc] ss:$28 sps:$4 sm:$0xff]   ;;  %v3113_v6 = vld [vmem:[#allocation6 + $0x3f0] ss:$28 sps:$4 sm:$0xff]  }
 0x156   :  { %2181 = vmatprep.subr.bf16.mxu1 %v3061_v7  ;;  %2263 = vmatprep.subr.bf16.mxu0 %v3064_v8  ;;  %v3116_v7 = vld [vmem:[#allocation6 + $0x3f8] ss:$28 sps:$4 sm:$0xff]   ;;  %v3121_v8 = vld [vmem:[#allocation6 + $0x42c] ss:$28 sps:$4 sm:$0xff]  }
 0x159   :  { %2182 = vmatpush1.bf16.msra.mxu1 %v3059_v9  ;;  %2264 = vmatpush1.bf16.msra.mxu0 %v3062_v10  ;;  %v3124_v9 = vld [vmem:[#allocation6 + $0x434] ss:$28 sps:$4 sm:$0xff]   ;;  %v3119_v10 = vld [vmem:[#allocation6 + $0x428] ss:$28 sps:$4 sm:$0xff]  }
 0x15a   :  { %2183 = vmatprep.subr.bf16.mxu1 %v3067_v11  ;;  %2265 = vmatprep.subr.bf16.mxu0 %v3070_v12  ;;  %v3122_v11 = vld [vmem:[#allocation6 + $0x430] ss:$28 sps:$4 sm:$0xff]   ;;  %v3127_v12 = vld [vmem:[#allocation6 + $0x464] ss:$28 sps:$4 sm:$0xff]  }
 0x15d   :  { %2184 = vmatpush1.bf16.msra.mxu1 %v3065_v13  ;;  %2266 = vmatpush1.bf16.msra.mxu0 %v3068_v14  ;;  %v3130_v13 = vld [vmem:[#allocation6 + $0x46c] ss:$28 sps:$4 sm:$0xff]   ;;  %v3125_v14 = vld [vmem:[#allocation6 + $0x460] ss:$28 sps:$4 sm:$0xff]  }
 0x15e   :  { %2185 = vmatprep.subr.bf16.mxu1 %v3073_v15  ;;  %2267 = vmatprep.subr.bf16.mxu0 %v3076_v16  ;;  %v3128_v15 = vld [vmem:[#allocation6 + $0x468] ss:$28 sps:$4 sm:$0xff]   ;;  %v3133_v16 = vld [vmem:[#allocation6 + $0x49c] ss:$28 sps:$4 sm:$0xff]  }
 0x161   :  { %2186 = vmatpush1.bf16.msra.mxu1 %v3071_v17  ;;  %2268 = vmatpush1.bf16.msra.mxu0 %v3074_v18  ;;  %v3136_v17 = vld [vmem:[#allocation6 + $0x4a4] ss:$28 sps:$4 sm:$0xff]   ;;  %v3131_v18 = vld [vmem:[#allocation6 + $0x498] ss:$28 sps:$4 sm:$0xff]  }
 0x162   :  { %2187 = vmatprep.subr.bf16.mxu1 %v3079_v19  ;;  %2269 = vmatprep.subr.bf16.mxu0 %v3082_v20  ;;  %v3134_v19 = vld [vmem:[#allocation6 + $0x4a0] ss:$28 sps:$4 sm:$0xff]   ;;  %v3139_v20 = vld [vmem:[#allocation6 + $0x4d4] ss:$28 sps:$4 sm:$0xff]  }
 0x165   :  { %2188 = vmatpush1.bf16.msra.mxu1 %v3077_v23  ;;  %2270 = vmatpush1.bf16.msra.mxu0 %v3080_v25  ;;  %v3142_v23 = vld [vmem:[#allocation6 + $0x4dc] ss:$28 sps:$4 sm:$0xff]   ;;  %v3137_v25 = vld [vmem:[#allocation6 + $0x4d0] ss:$28 sps:$4 sm:$0xff]  }
 0x166   :  { %2189 = vmatprep.subr.bf16.mxu1 %v3085_v26  ;;  %2271 = vmatprep.subr.bf16.mxu0 %v3088_v27  ;;  %v3140_v26 = vld [vmem:[#allocation6 + $0x4d8] ss:$28 sps:$4 sm:$0xff]   ;;  %v3145_v27 = vld [vmem:[#allocation6 + $0x50c] ss:$28 sps:$4 sm:$0xff]  }
 0x169   :  { %2190 = vmatpush1.bf16.msra.mxu1 %v3083_v28  ;;  %2272 = vmatpush1.bf16.msra.mxu0 %v3086_v29  ;;  %v3148_v28 = vld [vmem:[#allocation6 + $0x514] ss:$28 sps:$4 sm:$0xff]   ;;  %v3143_v29 = vld [vmem:[#allocation6 + $0x508] ss:$28 sps:$4 sm:$0xff]  }
 0x16a   :  { %2191 = vmatprep.subr.bf16.mxu1 %v3091_v30  ;;  %2273 = vmatprep.subr.bf16.mxu0 %v3094_v31  ;;  %v3146_v30 = vld [vmem:[#allocation6 + $0x510] ss:$28 sps:$4 sm:$0xff]   ;;  %v3151_v31 = vld [vmem:[#allocation6 + $0x544] ss:$28 sps:$4 sm:$0xff]  }
 0x16d   :  { %2192 = vmatpush1.bf16.msra.mxu1 %v3089_v32  ;;  %2274 = vmatpush1.bf16.msra.mxu0 %v3092_v33  ;;  %v3154_v32 = vld [vmem:[#allocation6 + $0x54c] ss:$28 sps:$4 sm:$0xff]   ;;  %v3149_v33 = vld [vmem:[#allocation6 + $0x540] ss:$28 sps:$4 sm:$0xff]  }
 0x16e   :  { %2193 = vmatprep.subr.bf16.mxu1 %v3097_v34  ;;  %2275 = vmatprep.subr.bf16.mxu0 %v3100_v35  ;;  %v3152_v34 = vld [vmem:[#allocation6 + $0x548] ss:$28 sps:$4 sm:$0xff]   ;;  %v3157_v35 = vld [vmem:[#allocation6 + $0x57c] ss:$28 sps:$4 sm:$0xff]  }
 0x171   :  { %2194 = vmatpush1.bf16.msra.mxu1 %v3095_v36  ;;  %2276 = vmatpush1.bf16.msra.mxu0 %v3098_v37  ;;  %v3160_v36 = vld [vmem:[#allocation6 + $0x584] ss:$28 sps:$4 sm:$0xff]   ;;  %v3155_v37 = vld [vmem:[#allocation6 + $0x578] ss:$28 sps:$4 sm:$0xff]  }
 0x172   :  { %2204 = vmatprep.subr.bf16.mxu1 %v3103_v38  ;;  %2286 = vmatprep.subr.bf16.mxu0 %v3106_v39  ;;  %v3158_v38 = vld [vmem:[#allocation6 + $0x580] ss:$28 sps:$4 sm:$0xff]   ;;  %v3163_v39 = vld [vmem:[#allocation6 + $0x5b4] ss:$28 sps:$4 sm:$0xff]  }
 0x207   :  { %v662_v45 = vpop.f32.mrb[0].mxu1  ;;  %v3524_v46 = vpop.f32.mrb[4].mxu0 }
 0x208   :  { %v663_v47 = vadd.f32 %v662_v45, %v291_v42  ;;  %v664_v48 = vpop.f32.mrb[1].mxu1  ;;  %v705_v49 = vpop.f32.mrb[5].mxu0  ;;  %v3166_v42 = vld [vmem:[#allocation6 + $0x5bc] ss:$28 sps:$4 sm:$0xff]   ;;  %v3169_v45 = vld [vmem:[#allocation6 + $0x5ec] ss:$28 sps:$4 sm:$0xff]  }
 0x209   :  { %v665_v50 = vadd.f32 %v664_v48, %v295_v43  ;;  %v706_v51 = vadd.f32 %v705_v49, %v303_v44  ;;  %v666_v52 = vpop.f32.mrb[2].mxu1  ;;  %v707_v53 = vpop.f32.mrb[6].mxu0  ;;  %v3161_v43 = vld [vmem:[#allocation6 + $0x5b0] ss:$28 sps:$4 sm:$0xff]   ;;  %v3164_v44 = vld [vmem:[#allocation6 + $0x5b8] ss:$28 sps:$4 sm:$0xff]  }
 0x20a   :  { %v710_v54 = vmax.f32 %v663_v47, 0.0  ;;  %v667_v55 = vpop.f32.mrb[3].mxu1  ;;  %v708_v56 = vpop.f32.mrb[7].mxu0  ;;  %v3172_v47 = vld [vmem:[#allocation6 + $0x5f4] ss:$28 sps:$4 sm:$0xff]  }
 0x20b   :  { %v711_v57 = vmax.f32 %v665_v50, 0.0  ;;  %v713_v58 = vmax.f32 %v706_v51, 0.0  ;;  %v3167_v48 = vld [vmem:[#allocation6 + $0x5e8] ss:$28 sps:$4 sm:$0xff]   ;;  %v3170_v49 = vld [vmem:[#allocation6 + $0x5f0] ss:$28 sps:$4 sm:$0xff]  }
 0x20c   :  { %v3528_v62 = vpack.c.bf16 %v710_v54, %v710_v54  ;;  %v3175_v50 = vld [vmem:[#allocation6 + $0x624] ss:$28 sps:$4 sm:$0xff]   ;;  %v3178_v51 = vld [vmem:[#allocation6 + $0x62c] ss:$28 sps:$4 sm:$0xff]   ;;  %v298_v54 = vsub.s32 2, %v3498_v21 }
 0x20d   :  { %v3526_v59 = vpack.c.bf16 %v711_v57, %v711_v57  ;;  %v3532_v1 = vpack.c.bf16 %v713_v58, %v713_v58  ;;  %v3173_v52 = vld [vmem:[#allocation6 + $0x620] ss:$28 sps:$4 sm:$0xff]   ;;  %v3176_v53 = vld [vmem:[#allocation6 + $0x628] ss:$28 sps:$4 sm:$0xff]   ;;  %v3179_v57 = vld [vmem:[#allocation6 + $0x658] ss:$28 sps:$4 sm:$0xff]  }
 0x20e   :  { %v3181_v55 = vld [vmem:[#allocation6 + $0x65c] ss:$28 sps:$4 sm:$0xff]   ;;  %v3184_v56 = vld [vmem:[#allocation6 + $0x664] ss:$28 sps:$4 sm:$0xff]  }
 0x20f   :  { %2195 = vmatprep.mubr.bf16.mxu1 %v3526_v59  ;;  %2277 = vmatprep.mubr.bf16.mxu0 %v3526_v59  ;;  %v3182_v58 = vld [vmem:[#allocation6 + $0x660] ss:$28 sps:$4 sm:$0xff]  }
 0x210   :  { %2196 = vmatmul.mubr.bf16.vlgmr.msra.gmra.mrb[4].mxu1 %v3528_v62  ;;  %2278 = vmatmul.mubr.bf16.vlgmr.msra.gmra.mrb[8].mxu0 %v3528_v62 }
 0x211   :  { %2205 = vmatpush1.bf16.msra.mxu1 %v3101_v60  ;;  %2287 = vmatpush1.bf16.msra.mxu0 %v3104_v61  ;;  %v299_v60 = vrot.slane %v3514_v40, %v298_v54  ;;  %v3187_v61 = vld [vmem:[#allocation6 + $0x694] ss:$28 sps:$4 sm:$0xff]  }
 0x212   :  { %2236 = vmatprep.mubr.bf16.mxu1 %v3532_v1  ;;  %2318 = vmatprep.mubr.bf16.mxu0 %v3532_v1  ;;  %v3199_v40 = vld [vmem:[#allocation6 + $0x14] ss:$28 sps:$4 sm:$0xff]  }
 0x213   :  { %2206 = vmatprep.subr.bf16.mxu1 %v3109_v63  ;;  %2288 = vmatprep.subr.bf16.mxu0 %v3112_v0  ;;  %v3190_v63 = vld [vmem:[#allocation6 + $0x69c] ss:$28 sps:$4 sm:$0xff]   ;;  %v3185_v0 = vld [vmem:[#allocation6 + $0x690] ss:$28 sps:$4 sm:$0xff]  }
 0x215   :  { %2207 = vmatpush1.bf16.msra.mxu1 %v3107_v2  ;;  %2289 = vmatpush1.bf16.msra.mxu0 %v3110_v3  ;;  %v3188_v2 = vld [vmem:[#allocation6 + $0x698] ss:$28 sps:$4 sm:$0xff]   ;;  %v704_v3 = vadd.f32 %v3524_v46, %v299_v60  ;;  %v3255_v60 = vld [vmem:[#allocation6 + $0x600] ss:$28 sps:$4 sm:$0xff]  }
 0x216   :  { %2208 = vmatprep.subr.bf16.mxu1 %v3115_v4  ;;  %2290 = vmatprep.subr.bf16.mxu0 %v3118_v5  ;;  %v3193_v4 = vld [vmem:[#allocation6 + $0x6cc] ss:$28 sps:$4 sm:$0xff]   ;;  %v3196_v5 = vld [vmem:[#allocation6 + $0x6d4] ss:$28 sps:$4 sm:$0xff]  }
 0x217   :  { %v3201_v46 = vld [vmem:[#allocation6 + $0x18] ss:$28 sps:$4 sm:$0xff]  }
 0x219   :  { %2209 = vmatpush1.bf16.msra.mxu1 %v3113_v6  ;;  %2291 = vmatpush1.bf16.msra.mxu0 %v3116_v7  ;;  %v3191_v6 = vld [vmem:[#allocation6 + $0x6c8] ss:$28 sps:$4 sm:$0xff]   ;;  %v3194_v7 = vld [vmem:[#allocation6 + $0x6d0] ss:$28 sps:$4 sm:$0xff]  }
 0x21a   :  { %2210 = vmatprep.subr.bf16.mxu1 %v3121_v8  ;;  %2292 = vmatprep.subr.bf16.mxu0 %v3124_v9  ;;  %v712_v8 = vmax.f32 %v704_v3, 0.0  ;;  %v3200_v9 = vld [vmem:[#allocation6 + $0x1d8] ss:$28 sps:$4 sm:$0xff]   ;;  %v3257_v3 = vld [vmem:[#allocation6 + $0x2b0] ss:$28 sps:$4 sm:$0xff]  }
 0x21d   :  { %2211 = vmatpush1.bf16.msra.mxu1 %v3119_v10  ;;  %2293 = vmatpush1.bf16.msra.mxu0 %v3122_v11  ;;  %v3197_v10 = vld [vmem:[#allocation6 + $0x10] ss:$28 sps:$4 sm:$0xff]   ;;  %v3543_v11 = vpack.c.bf16 %v712_v8, %v712_v8 }
 0x21e   :  { %2212 = vmatprep.subr.bf16.mxu1 %v3127_v12  ;;  %2294 = vmatprep.subr.bf16.mxu0 %v3130_v13  ;;  %v3204_v12 = vld [vmem:[#allocation6 + $0x4c] ss:$28 sps:$4 sm:$0xff]  }
 0x21f   :  { %v3205_v13 = vld [vmem:[#allocation6 + $0x210] ss:$28 sps:$4 sm:$0xff]  }
 0x220   :  { %v3266_v8 = vld [vmem:[#allocation6 + $0x4b0] ss:$28 sps:$4 sm:$0xff]  }
 0x221   :  { %2213 = vmatpush1.bf16.msra.mxu1 %v3125_v14  ;;  %2295 = vmatpush1.bf16.msra.mxu0 %v3128_v15  ;;  %v3202_v14 = vld [vmem:[#allocation6 + $0x48] ss:$28 sps:$4 sm:$0xff]   ;;  %v3206_v15 = vld [vmem:[#allocation6 + $0x50] ss:$28 sps:$4 sm:$0xff]  }
 0x222   :  { %2214 = vmatprep.subr.bf16.mxu1 %v3133_v16  ;;  %2296 = vmatprep.subr.bf16.mxu0 %v3136_v17  ;;  %v3209_v16 = vld [vmem:[#allocation6 + $0x84] ss:$28 sps:$4 sm:$0xff]  }
 0x223   :  { %v3210_v17 = vld [vmem:[#allocation6 + $0x248] ss:$28 sps:$4 sm:$0xff]  }
 0x225   :  { %2215 = vmatpush1.bf16.msra.mxu1 %v3131_v18  ;;  %2297 = vmatpush1.bf16.msra.mxu0 %v3134_v19  ;;  %v3207_v18 = vld [vmem:[#allocation6 + $0x80] ss:$28 sps:$4 sm:$0xff]   ;;  %v3211_v19 = vld [vmem:[#allocation6 + $0x88] ss:$28 sps:$4 sm:$0xff]  }
 0x226   :  { %2216 = vmatprep.subr.bf16.mxu1 %v3139_v20  ;;  %2298 = vmatprep.subr.bf16.mxu0 %v3142_v23  ;;  %v3214_v20 = vld [vmem:[#allocation6 + $0xbc] ss:$28 sps:$4 sm:$0xff]  }
 0x227   :  { %v3215_v23 = vld [vmem:[#allocation6 + $0x280] ss:$28 sps:$4 sm:$0xff]  }
 0x229   :  { %2217 = vmatpush1.bf16.msra.mxu1 %v3137_v25  ;;  %2299 = vmatpush1.bf16.msra.mxu0 %v3140_v26  ;;  %v3212_v25 = vld [vmem:[#allocation6 + $0xb8] ss:$28 sps:$4 sm:$0xff]   ;;  %v3216_v26 = vld [vmem:[#allocation6 + $0xc0] ss:$28 sps:$4 sm:$0xff]  }
 0x22a   :  { %2218 = vmatprep.subr.bf16.mxu1 %v3145_v27  ;;  %2300 = vmatprep.subr.bf16.mxu0 %v3148_v28  ;;  %v3219_v27 = vld [vmem:[#allocation6 + $0xf4] ss:$28 sps:$4 sm:$0xff]  }
 0x22b   :  { %v3217_v28 = vld [vmem:[#allocation6 + $0xf0] ss:$28 sps:$4 sm:$0xff]  }
 0x22d   :  { %2219 = vmatpush1.bf16.msra.mxu1 %v3143_v29  ;;  %2301 = vmatpush1.bf16.msra.mxu0 %v3146_v30  ;;  %v3221_v29 = vld [vmem:[#allocation6 + $0xf8] ss:$28 sps:$4 sm:$0xff]   ;;  %v3224_v30 = vld [vmem:[#allocation6 + $0x12c] ss:$28 sps:$4 sm:$0xff]  }
 0x22e   :  { %2220 = vmatprep.subr.bf16.mxu1 %v3151_v31  ;;  %2302 = vmatprep.subr.bf16.mxu0 %v3154_v32  ;;  %v3225_v31 = vld [vmem:[#allocation6 + $0x2f0] ss:$28 sps:$4 sm:$0xff]   ;;  %v3222_v32 = vld [vmem:[#allocation6 + $0x128] ss:$28 sps:$4 sm:$0xff]  }
 0x231   :  { %2221 = vmatpush1.bf16.msra.mxu1 %v3149_v33  ;;  %2303 = vmatpush1.bf16.msra.mxu0 %v3152_v34  ;;  %v3226_v33 = vld [vmem:[#allocation6 + $0x130] ss:$28 sps:$4 sm:$0xff]   ;;  %v3229_v34 = vld [vmem:[#allocation6 + $0x164] ss:$28 sps:$4 sm:$0xff]  }
 0x232   :  { %2222 = vmatprep.subr.bf16.mxu1 %v3157_v35  ;;  %2304 = vmatprep.subr.bf16.mxu0 %v3160_v36  ;;  %v3230_v35 = vld [vmem:[#allocation6 + $0x328] ss:$28 sps:$4 sm:$0xff]   ;;  %v3227_v36 = vld [vmem:[#allocation6 + $0x160] ss:$28 sps:$4 sm:$0xff]  }
 0x235   :  { %2223 = vmatpush1.bf16.msra.mxu1 %v3155_v37  ;;  %2305 = vmatpush1.bf16.msra.mxu0 %v3158_v38  ;;  %v3231_v37 = vld [vmem:[#allocation6 + $0x168] ss:$28 sps:$4 sm:$0xff]   ;;  %v3234_v38 = vld [vmem:[#allocation6 + $0x19c] ss:$28 sps:$4 sm:$0xff]  }
 0x236   :  { %2224 = vmatprep.subr.bf16.mxu1 %v3163_v39  ;;  %2306 = vmatprep.subr.bf16.mxu0 %v3166_v42  ;;  %v3235_v39 = vld [vmem:[#allocation6 + $0x360] ss:$28 sps:$4 sm:$0xff]   ;;  %v3232_v42 = vld [vmem:[#allocation6 + $0x198] ss:$28 sps:$4 sm:$0xff]  }
 0x239   :  { %2225 = vmatpush1.bf16.msra.mxu1 %v3161_v43  ;;  %2307 = vmatpush1.bf16.msra.mxu0 %v3164_v44  ;;  %v3236_v43 = vld [vmem:[#allocation6 + $0x1a0] ss:$28 sps:$4 sm:$0xff]   ;;  %v3239_v44 = vld [vmem:[#allocation6 + $0x1d4] ss:$28 sps:$4 sm:$0xff]  }
 0x23a   :  { %2226 = vmatprep.subr.bf16.mxu1 %v3169_v45  ;;  %2308 = vmatprep.subr.bf16.mxu0 %v3172_v47  ;;  %v3240_v45 = vld [vmem:[#allocation6 + $0x558] ss:$28 sps:$4 sm:$0xff]   ;;  %v3237_v47 = vld [vmem:[#allocation6 + $0x1d0] ss:$28 sps:$4 sm:$0xff]  }
 0x23d   :  { %2227 = vmatpush1.bf16.msra.mxu1 %v3167_v48  ;;  %2309 = vmatpush1.bf16.msra.mxu0 %v3170_v49  ;;  %v3241_v48 = vld [vmem:[#allocation6 + $0x398] ss:$28 sps:$4 sm:$0xff]   ;;  %v3244_v49 = vld [vmem:[#allocation6 + $0x20c] ss:$28 sps:$4 sm:$0xff]  }
 0x23e   :  { %2228 = vmatprep.subr.bf16.mxu1 %v3175_v50  ;;  %2310 = vmatprep.subr.bf16.mxu0 %v3178_v51  ;;  %v3245_v50 = vld [vmem:[#allocation6 + $0x590] ss:$28 sps:$4 sm:$0xff]   ;;  %v3242_v51 = vld [vmem:[#allocation6 + $0x208] ss:$28 sps:$4 sm:$0xff]  }
 0x241   :  { %2229 = vmatpush1.bf16.msra.mxu1 %v3173_v52  ;;  %2311 = vmatpush1.bf16.msra.mxu0 %v3176_v53  ;;  %v3246_v52 = vld [vmem:[#allocation6 + $0x3d0] ss:$28 sps:$4 sm:$0xff]   ;;  %v3249_v53 = vld [vmem:[#allocation6 + $0x244] ss:$28 sps:$4 sm:$0xff]  }
 0x242   :  { %2230 = vmatprep.subr.bf16.mxu1 %v3181_v55  ;;  %2312 = vmatprep.subr.bf16.mxu0 %v3184_v56  ;;  %v3250_v55 = vld [vmem:[#allocation6 + $0x5c8] ss:$28 sps:$4 sm:$0xff]   ;;  %v3247_v56 = vld [vmem:[#allocation6 + $0x240] ss:$28 sps:$4 sm:$0xff]  }
 0x245   :  { %2231 = vmatpush1.bf16.msra.mxu1 %v3179_v57  ;;  %2313 = vmatpush1.bf16.msra.mxu0 %v3182_v58  ;;  %v3251_v57 = vld [vmem:[#allocation6 + $0x408] ss:$28 sps:$4 sm:$0xff]   ;;  %v3254_v58 = vld [vmem:[#allocation6 + $0x27c] ss:$28 sps:$4 sm:$0xff]  }
 0x246   :  { %2232 = vmatprep.subr.bf16.mxu1 %v3187_v61  ;;  %2314 = vmatprep.subr.bf16.mxu0 %v3190_v63  ;;  %v3252_v61 = vld [vmem:[#allocation6 + $0x278] ss:$28 sps:$4 sm:$0xff]   ;;  %v3256_v63 = vld [vmem:[#allocation6 + $0x440] ss:$28 sps:$4 sm:$0xff]  }
 0x249   :  { %2233 = vmatpush1.bf16.msra.mxu1 %v3185_v0  ;;  %2315 = vmatpush1.bf16.msra.mxu0 %v3188_v2  ;;  %v3259_v0 = vld [vmem:[#allocation6 + $0x2b4] ss:$28 sps:$4 sm:$0xff]  }
 0x24a   :  { %2234 = vmatprep.subr.bf16.mxu1 %v3193_v4  ;;  %2316 = vmatprep.subr.bf16.mxu0 %v3196_v5  ;;  %v3260_v2 = vld [vmem:[#allocation6 + $0x638] ss:$28 sps:$4 sm:$0xff]   ;;  %v3264_v5 = vld [vmem:[#allocation6 + $0x2ec] ss:$28 sps:$4 sm:$0xff]  }
 0x24b   :  { %v3261_v4 = vld [vmem:[#allocation6 + $0x478] ss:$28 sps:$4 sm:$0xff]  }
 0x24d   :  { %2235 = vmatpush1.bf16.msra.mxu1 %v3191_v6  ;;  %2317 = vmatpush1.bf16.msra.mxu0 %v3194_v7  ;;  %v3265_v6 = vld [vmem:[#allocation6 + $0x670] ss:$28 sps:$4 sm:$0xff]   ;;  %v3262_v7 = vld [vmem:[#allocation6 + $0x2e8] ss:$28 sps:$4 sm:$0xff]  }
 0x24e   :  { %2327 = vmatprep.subr.bf16.mxu1 %v3199_v40  ;;  %2813 = vmatprep.subr.bf16.mxu0 %v3200_v9  ;;  %v3269_v40 = vld [vmem:[#allocation6 + $0x324] ss:$28 sps:$4 sm:$0xff]  }
 0x24f   :  { %v3270_v9 = vld [vmem:[#allocation6 + $0x6a8] ss:$28 sps:$4 sm:$0xff]  }
 0x250   :  { %2237 = vmatmul.mubr.bf16.vlgmr.msra.gmra.mrb[4].mxu1 %v3543_v11  ;;  %2319 = vmatmul.mubr.bf16.vlgmr.msra.gmra.mrb[8].mxu0 %v3543_v11 }
 0x251   :  { %2328 = vmatpush1.bf16.msra.mxu1 %v3197_v10  ;;  %2359 = vmatprep.mubr.bf16.mxu1 %v3526_v59  ;;  %v3267_v10 = vld [vmem:[#allocation6 + $0x320] ss:$28 sps:$4 sm:$0xff]  }
 0x252   :  { %2814 = vmatpush3.bf16.msra.mxu0 %v3201_v46  ;;  %2441 = vmatprep.mubr.bf16.mxu0 %v3526_v59  ;;  %v3220_v59 = vld [vmem:[#allocation6 + $0x2b8] ss:$28 sps:$4 sm:$0xff]   ;;  %v3271_v46 = vld [vmem:[#allocation6 + $0x4e8] ss:$28 sps:$4 sm:$0xff]  }
 0x253   :  { %2329 = vmatprep.subr.bf16.mxu1 %v3204_v12  ;;  %2815 = vmatprep.subr.bf16.mxu0 %v3205_v13  ;;  %v3274_v12 = vld [vmem:[#allocation6 + $0x35c] ss:$28 sps:$4 sm:$0xff]  }
 0x254   :  { %v3275_v13 = vld [vmem:[#allocation6 + $0x6e0] ss:$28 sps:$4 sm:$0xff]  }
 0x255   :  { %2330 = vmatpush1.bf16.msra.mxu1 %v3202_v14  ;;  %v3272_v14 = vld [vmem:[#allocation6 + $0x358] ss:$28 sps:$4 sm:$0xff]  }
 0x256   :  { %2816 = vmatpush3.bf16.msra.mxu0 %v3206_v15  ;;  %2331 = vmatprep.subr.bf16.mxu1 %v3209_v16  ;;  %v3276_v15 = vld [vmem:[#allocation6 + $0x520] ss:$28 sps:$4 sm:$0xff]   ;;  %v3279_v16 = vld [vmem:[#allocation6 + $0x394] ss:$28 sps:$4 sm:$0xff]  }
 0x257   :  { %2817 = vmatprep.subr.bf16.mxu0 %v3210_v17  ;;  %v3277_v17 = vld [vmem:[#allocation6 + $0x390] ss:$28 sps:$4 sm:$0xff]  }
 0x259   :  { %2332 = vmatpush1.bf16.msra.mxu1 %v3207_v18  ;;  %v3282_v18 = vld [vmem:[#allocation6 + $0x3cc] ss:$28 sps:$4 sm:$0xff]  }
 0x25a   :  { %2818 = vmatpush3.bf16.msra.mxu0 %v3211_v19  ;;  %2333 = vmatprep.subr.bf16.mxu1 %v3214_v20  ;;  %v3280_v19 = vld [vmem:[#allocation6 + $0x3c8] ss:$28 sps:$4 sm:$0xff]  }
 0x25b   :  { %2819 = vmatprep.subr.bf16.mxu0 %v3215_v23  ;;  %v3285_v20 = vld [vmem:[#allocation6 + $0x404] ss:$28 sps:$4 sm:$0xff]  }
 0x25c   :  { %v3283_v23 = vld [vmem:[#allocation6 + $0x400] ss:$28 sps:$4 sm:$0xff]  }
 0x25d   :  { %2334 = vmatpush1.bf16.msra.mxu1 %v3212_v25  ;;  %v3288_v25 = vld [vmem:[#allocation6 + $0x43c] ss:$28 sps:$4 sm:$0xff]  }
 0x25e   :  { %2820 = vmatpush3.bf16.msra.mxu0 %v3216_v26  ;;  %2335 = vmatprep.subr.bf16.mxu1 %v3219_v27  ;;  %v3286_v26 = vld [vmem:[#allocation6 + $0x438] ss:$28 sps:$4 sm:$0xff]  }
 0x25f   :  { %2821 = vmatprep.subr.bf16.mxu0 %v3220_v59  ;;  %v3291_v27 = vld [vmem:[#allocation6 + $0x474] ss:$28 sps:$4 sm:$0xff]  }
 0x260   :  { %v3289_v59 = vld [vmem:[#allocation6 + $0x470] ss:$28 sps:$4 sm:$0xff]  }
 0x261   :  { %2336 = vmatpush1.bf16.msra.mxu1 %v3217_v28  ;;  %v3292_v28 = vld [vmem:[#allocation6 + $0x4a8] ss:$28 sps:$4 sm:$0xff]  }
 0x262   :  { %2822 = vmatpush3.bf16.msra.mxu0 %v3221_v29  ;;  %2337 = vmatprep.subr.bf16.mxu1 %v3224_v30  ;;  %v3297_v29 = vld [vmem:[#allocation6 + $0x4e4] ss:$28 sps:$4 sm:$0xff]   ;;  %v3300_v30 = vld [vmem:[#allocation6 + $0x51c] ss:$28 sps:$4 sm:$0xff]  }
 0x263   :  { %2823 = vmatprep.subr.bf16.mxu0 %v3225_v31  ;;  %v3298_v31 = vld [vmem:[#allocation6 + $0x518] ss:$28 sps:$4 sm:$0xff]  }
 0x265   :  { %2338 = vmatpush1.bf16.msra.mxu1 %v3222_v32  ;;  %v3303_v32 = vld [vmem:[#allocation6 + $0x554] ss:$28 sps:$4 sm:$0xff]  }
 0x266   :  { %2824 = vmatpush3.bf16.msra.mxu0 %v3226_v33  ;;  %2339 = vmatprep.subr.bf16.mxu1 %v3229_v34  ;;  %v3301_v33 = vld [vmem:[#allocation6 + $0x550] ss:$28 sps:$4 sm:$0xff]  }
 0x267   :  { %2825 = vmatprep.subr.bf16.mxu0 %v3230_v35  ;;  %v3306_v34 = vld [vmem:[#allocation6 + $0x58c] ss:$28 sps:$4 sm:$0xff]  }
 0x268   :  { %v3304_v35 = vld [vmem:[#allocation6 + $0x588] ss:$28 sps:$4 sm:$0xff]  }
 0x269   :  { %2340 = vmatpush1.bf16.msra.mxu1 %v3227_v36  ;;  %v3309_v36 = vld [vmem:[#allocation6 + $0x5c4] ss:$28 sps:$4 sm:$0xff]  }
 0x26a   :  { %2826 = vmatpush3.bf16.msra.mxu0 %v3231_v37  ;;  %2341 = vmatprep.subr.bf16.mxu1 %v3234_v38  ;;  %v3307_v37 = vld [vmem:[#allocation6 + $0x5c0] ss:$28 sps:$4 sm:$0xff]  }
 0x26b   :  { %2827 = vmatprep.subr.bf16.mxu0 %v3235_v39  ;;  %v3312_v38 = vld [vmem:[#allocation6 + $0x5fc] ss:$28 sps:$4 sm:$0xff]  }
 0x26c   :  { %v3310_v39 = vld [vmem:[#allocation6 + $0x5f8] ss:$28 sps:$4 sm:$0xff]  }
 0x26d   :  { %2342 = vmatpush1.bf16.msra.mxu1 %v3232_v42  ;;  %v3315_v42 = vld [vmem:[#allocation6 + $0x634] ss:$28 sps:$4 sm:$0xff]  }
 0x26e   :  { %2828 = vmatpush3.bf16.msra.mxu0 %v3236_v43  ;;  %2343 = vmatprep.subr.bf16.mxu1 %v3239_v44  ;;  %v3313_v43 = vld [vmem:[#allocation6 + $0x630] ss:$28 sps:$4 sm:$0xff]  }
 0x26f   :  { %2835 = vmatprep.subr.bf16.mxu0 %v3240_v45  ;;  %v3318_v44 = vld [vmem:[#allocation6 + $0x66c] ss:$28 sps:$4 sm:$0xff]  }
 0x270   :  { %v3316_v45 = vld [vmem:[#allocation6 + $0x668] ss:$28 sps:$4 sm:$0xff]  }
 0x271   :  { %2442 = vmatmul.mubr.bf16.vlgmr.msra.gmra.mrb[12].mxu0 %v3528_v62  ;;  %2344 = vmatpush1.bf16.msra.mxu1 %v3237_v47  ;;  %v3321_v47 = vld [vmem:[#allocation6 + $0x6a4] ss:$28 sps:$4 sm:$0xff]  }
 0x272   :  { %2836 = vmatpush3.bf16.msra.mxu0 %v3241_v48  ;;  %2481 = vmatprep.mubr.bf16.mxu0 %v3532_v1  ;;  %v3319_v48 = vld [vmem:[#allocation6 + $0x6a0] ss:$28 sps:$4 sm:$0xff]  }
 0x273   :  { %2345 = vmatprep.subr.bf16.mxu1 %v3244_v49  ;;  %2837 = vmatprep.subr.bf16.mxu0 %v3245_v50  ;;  %v3324_v49 = vld [vmem:[#allocation6 + $0x6dc] ss:$28 sps:$4 sm:$0xff]  }
 0x274   :  { %v3322_v50 = vld [vmem:[#allocation6 + $0x6d8] ss:$28 sps:$4 sm:$0xff]  }
 0x275   :  { %2346 = vmatpush1.bf16.msra.mxu1 %v3242_v51  ;;  %v974_v51 = vld [vmem:[%s3594_s6] sm:$0xff] }
 0x276   :  { %2838 = vmatpush3.bf16.msra.mxu0 %v3246_v52  ;;  %2347 = vmatprep.subr.bf16.mxu1 %v3249_v53  ;;  %v979_v52 = vrot.slane %v974_v51, %v3501_v22  ;;  %v987_v53 = vrot.slane %v974_v51, %v298_v54 }
 0x277   :  { %2839 = vmatprep.subr.bf16.mxu0 %v3250_v55  ;;  %v983_v55 = vrot.slane %v974_v51, %v3507_v24 }
 0x279   :  { %2348 = vmatpush1.bf16.msra.mxu1 %v3247_v56  ;;  %v991_v56 = vrot.slane %v974_v51, %v302_v41 }
 0x27a   :  { %2840 = vmatpush3.bf16.msra.mxu0 %v3251_v57  ;;  %2349 = vmatprep.subr.bf16.mxu1 %v3254_v58 }
 0x27b   :  { %2841 = vmatprep.subr.bf16.mxu0 %v3255_v60 }
 0x27d   :  { %2350 = vmatpush1.bf16.msra.mxu1 %v3252_v61 }
 0x27e   :  { %2842 = vmatpush3.bf16.msra.mxu0 %v3256_v63  ;;  %2351 = vmatprep.subr.bf16.mxu1 %v3259_v0 }
 0x27f   :  { %2843 = vmatprep.subr.bf16.mxu0 %v3260_v2 }
 0x281   :  { %2352 = vmatpush1.bf16.msra.mxu1 %v3257_v3 }
 0x282   :  { %2844 = vmatpush3.bf16.msra.mxu0 %v3261_v4  ;;  %2353 = vmatprep.subr.bf16.mxu1 %v3264_v5 }
 0x283   :  { %2845 = vmatprep.subr.bf16.mxu0 %v3265_v6 }
 0x285   :  { %2354 = vmatpush1.bf16.msra.mxu1 %v3262_v7 }
 0x286   :  { %2846 = vmatpush3.bf16.msra.mxu0 %v3266_v8  ;;  %2355 = vmatprep.subr.bf16.mxu1 %v3269_v40 }
 0x287   :  { %2847 = vmatprep.subr.bf16.mxu0 %v3270_v9 }
 0x289   :  { %2356 = vmatpush1.bf16.msra.mxu1 %v3267_v10 }
 0x28a   :  { %2848 = vmatpush3.bf16.msra.mxu0 %v3271_v46  ;;  %2357 = vmatprep.subr.bf16.mxu1 %v3274_v12  ;;  %v1002_v46 = vsub.s32 6, %v3498_v21 }
 0x28b   :  { %2849 = vmatprep.subr.bf16.mxu0 %v3275_v13 }
 0x28c   :  { %v1003_v12 = vrot.slane %v974_v51, %v1002_v46 }
 0x28d   :  { %2358 = vmatpush1.bf16.msra.mxu1 %v3272_v14 }
 0x28e   :  { %2850 = vmatpush3.bf16.msra.mxu0 %v3276_v15  ;;  %2368 = vmatprep.subr.bf16.mxu1 %v3279_v16 }
 0x290   :  { %2360 = vmatmul.mubr.bf16.vlgmr.msra.gmra.mrb[8].mxu1 %v3528_v62  ;;  %v3294_v62 = vld [vmem:[#allocation6 + $0x4ac] ss:$28 sps:$4 sm:$0xff]  }
 0x291   :  { %2482 = vmatmul.mubr.bf16.vlgmr.msra.gmra.mrb[16].mxu0 %v3543_v11  ;;  %2369 = vmatpush1.bf16.msra.mxu1 %v3277_v17 }
 0x292   :  { %2400 = vmatprep.mubr.bf16.mxu1 %v3532_v1  ;;  %2370 = vmatprep.subr.bf16.mxu1 %v3282_v18  ;;  %v3295_v1 = vld [vmem:[#allocation6 + $0x4e0] ss:$28 sps:$4 sm:$0xff]  }
 0x295   :  { %2371 = vmatpush1.bf16.msra.mxu1 %v3280_v19 }
 0x296   :  { %2372 = vmatprep.subr.bf16.mxu1 %v3285_v20 }
 0x299   :  { %2373 = vmatpush1.bf16.msra.mxu1 %v3283_v23  ;;  %v994_v23 = vsub.s32 4, %v3498_v21 }
 0x29a   :  { %2374 = vmatprep.subr.bf16.mxu1 %v3288_v25  ;;  %v998_v25 = vsub.s32 5, %v3498_v21 }
 0x29d   :  { %2375 = vmatpush1.bf16.msra.mxu1 %v3286_v26  ;;  %v995_v26 = vrot.slane %v974_v51, %v994_v23 }
 0x29e   :  { %2376 = vmatprep.subr.bf16.mxu1 %v3291_v27  ;;  %v999_v27 = vrot.slane %v974_v51, %v998_v25 }
 0x2a1   :  { %2377 = vmatpush1.bf16.msra.mxu1 %v3289_v59 }
 0x2a2   :  { %2378 = vmatprep.subr.bf16.mxu1 %v3294_v62 }
 0x2a5   :  { %2379 = vmatpush1.bf16.msra.mxu1 %v3292_v28 }
 0x2a6   :  { %2380 = vmatprep.subr.bf16.mxu1 %v3297_v29 }
 0x2a9   :  { %2381 = vmatpush1.bf16.msra.mxu1 %v3295_v1 }
 0x2aa   :  { %2382 = vmatprep.subr.bf16.mxu1 %v3300_v30 }
 0x2ad   :  { %2383 = vmatpush1.bf16.msra.mxu1 %v3298_v31 }
 0x2ae   :  { %2384 = vmatprep.subr.bf16.mxu1 %v3303_v32 }
 0x2b1   :  { %2385 = vmatpush1.bf16.msra.mxu1 %v3301_v33 }
 0x2b2   :  { %2386 = vmatprep.subr.bf16.mxu1 %v3306_v34 }
 0x2b5   :  { %2387 = vmatpush1.bf16.msra.mxu1 %v3304_v35 }
 0x2b6   :  { %2388 = vmatprep.subr.bf16.mxu1 %v3309_v36 }
 0x2b9   :  { %2389 = vmatpush1.bf16.msra.mxu1 %v3307_v37 }
 0x2ba   :  { %2390 = vmatprep.subr.bf16.mxu1 %v3312_v38 }
 0x2bd   :  { %2391 = vmatpush1.bf16.msra.mxu1 %v3310_v39 }
 0x2be   :  { %2392 = vmatprep.subr.bf16.mxu1 %v3315_v42 }
 0x2c1   :  { %2393 = vmatpush1.bf16.msra.mxu1 %v3313_v43 }
 0x2c2   :  { %2394 = vmatprep.subr.bf16.mxu1 %v3318_v44 }
 0x2c5   :  { %2395 = vmatpush1.bf16.msra.mxu1 %v3316_v45 }
 0x2c6   :  { %2396 = vmatprep.subr.bf16.mxu1 %v3321_v47 }
 0x2c9   :  { %2397 = vmatpush1.bf16.msra.mxu1 %v3319_v48 }
 0x2ca   :  { %2398 = vmatprep.subr.bf16.mxu1 %v3324_v49 }
 0x2cd   :  { %2399 = vmatpush1.bf16.msra.mxu1 %v3322_v50 }
 0x2d0   :  { %2401 = vmatmul.mubr.bf16.vlgmr.msra.gmra.mrb[8].mxu1 %v3543_v11 }
 0x323   :  { %v2238_v57 = vpop.f32.mrb[4].mxu1  ;;  %v2320_v58 = vpop.f32.mrb[8].mxu0 }
 0x324   :  { %v2857_v60 = vadd.f32 %v2238_v57, %v979_v52  ;;  %v2859_v61 = vadd.f32 %v2320_v58, %v987_v53  ;;  %v2240_v63 = vpop.f32.mrb[5].mxu1  ;;  %v2322_v11 = vpop.f32.mrb[9].mxu0 }
 0x325   :  { %v2858_v0 = vadd.f32 %v2240_v63, %v983_v55  ;;  %v2860_v2 = vadd.f32 %v2322_v11, %v991_v56  ;;  %v2242_v3 = vpop.f32.mrb[6].mxu1  ;;  %v2324_v4 = vpop.f32.mrb[10].mxu0 }
 0x326   :  { %3325 = vtanh.f32 %v2857_v60  ;;  %v2243_v22 = vpop.f32.mrb[7].mxu1  ;;  %v2325_v5 = vpop.f32.mrb[11].mxu0 }
 0x327   :  { %3327 = vtanh.f32 %v2859_v61 }
 0x328   :  { %3329 = vtanh.f32 %v2858_v0 }
 0x329   :  { %3331 = vtanh.f32 %v2860_v2 }
 0x330   :  { %v3326_v24 = vpop.eup %3325 }
 0x331   :  { %v3328_v54 = vpop.eup %3327  ;;  %2496 = vst [vmem:[%s3595_s7] sm:$0xff] %v3326_v24 }
 0x332   :  { %v3330_v41 = vpop.eup %3329  ;;  %2498 = vst [vmem:[%s3595_s7 + $0x10] sm:$0xff] %v3328_v54 }
 0x333   :  { %v3332_v6 = vpop.eup %3331  ;;  %2497 = vst [vmem:[%s3595_s7 + $0x8] sm:$0xff] %v3330_v41 }
 0x334   :  { %2499 = vst [vmem:[%s3595_s7 + $0x18] sm:$0xff] %v3332_v6 }
 0x344   :  { %v2829_v7 = vpop.f32.mrb[12].mxu0 }
 0x345   :  { %v2830_v8 = vpop.f32.mrb[13].mxu0 }
 0x346   :  { %v2831_v40 = vadd.f32 %v2830_v8, %v2829_v7  ;;  %v2832_v9 = vpop.f32.mrb[14].mxu0 }
 0x347   :  { %v2833_v10 = vpop.f32.mrb[15].mxu0 }
 0x348   :  { %v2444_v15 = vadd.f32 %v2831_v40, %v1003_v12 }
 0x364   :  { %v2851_v13 = vpop.f32.mrb[16].mxu0 }
 0x365   :  { %v2852_v14 = vpop.f32.mrb[17].mxu0 }
 0x366   :  { %v2853_v16 = vadd.f32 %v2852_v14, %v2851_v13  ;;  %v2854_v17 = vpop.f32.mrb[18].mxu0 }
 0x367   :  { %v2855_v18 = vpop.f32.mrb[19].mxu0 }
 0x368   :  { %v2484_v19 = vadd.f32 %v2853_v16, %v2444_v15 }
 0x36a   :  { %3333 = vtanh.f32 %v2484_v19 }
 0x374   :  { %v3334_v20 = vpop.eup %3333 }
 0x375   :  { %2502 = vst [vmem:[%s3595_s7 + $0x30] sm:$0xff] %v3334_v20 }
 0x3a3   :  { %v2402_v59 = vpop.f32.mrb[8].mxu1 }
 0x3a4   :  { %v2861_v62 = vadd.f32 %v2402_v59, %v995_v26  ;;  %v2404_v28 = vpop.f32.mrb[9].mxu1 }
 0x3a5   :  { %v2862_v29 = vadd.f32 %v2404_v28, %v999_v27  ;;  %v2406_v1 = vpop.f32.mrb[10].mxu1 }
 0x3a6   :  { %3335 = vtanh.f32 %v2861_v62  ;;  %v2407_v30 = vpop.f32.mrb[11].mxu1 }
 0x3a7   :  { %3337 = vtanh.f32 %v2862_v29 }
 0x3b0   :  { %v3336_v31 = vpop.eup %3335 }
 0x3b1   :  { %v3338_v32 = vpop.eup %3337  ;;  %2500 = vst [vmem:[%s3595_s7 + $0x20] sm:$0xff] %v3336_v31 }
 0x3b2   :  { %2501 = vst [vmem:[%s3595_s7 + $0x28] sm:$0xff] %v3338_v32 }
 0x3b3   :  { %2507 = vsyncpa [#allocation3], 1 }
 0x3b4   :  { %2508 = vsyncpa [#allocation5], 1 }

</bundles_post_ra>
